<compile_context>
chip_gen: v7x
topology: tpu7x:2x2x1
jax: 0.10.0
libtpu: 0.0.40
codegen_flags: <defaults>
</compile_context>

<pallas_src>
import functools

import jax
import jax.numpy as jnp
from jax.experimental import pallas as pl
from jax.experimental.pallas import tpu as pltpu


def _bottom_kernel(xq_ref, xk_ref, w_qkv_ref, b_qkv_ref, gamma_ref, beta_ref,
                   w_o_ref, b_o_ref, out_ref,
                   q_scr, m_scr, l_scr, acc_scr,
                   *, qk_dim, n_valid, n_padded, tk, eps):
    # xq_ref / xk_ref: (1, TQ|TK, Cin*4) bf16 patch tiles (query / kv tokens)
    # w_qkv_ref:       (Cin*4, 2*qk+v) bf16  (q columns pre-scaled by 1/sqrt(qk))
    # b_qkv_ref:       (1, 2*qk+v) f32       (q entries pre-scaled)
    # gamma/beta_ref:  (1, v) f32
    # w_o_ref:         (v, OC*4) bf16,  b_o_ref: (1, OC*4) f32
    # out_ref:         (1, TQ, OC*4) f32
    ki = pl.program_id(2)
    nk = pl.num_programs(2)

    @pl.when(ki == 0)
    def _init():
        # Fused qkv projection on the query-tile patches (one MXU pass); keep
        # only the q lanes via a static slice inside a single 128-lane vreg.
        qkv_q = (jnp.dot(xq_ref[0], w_qkv_ref[...],
                         preferred_element_type=jnp.float32) + b_qkv_ref[...])
        q_scr[...] = qkv_q[:, :qk_dim].astype(jnp.bfloat16)
        m_scr[...] = jnp.full(m_scr.shape, -jnp.inf, jnp.float32)
        l_scr[...] = jnp.zeros(l_scr.shape, jnp.float32)
        acc_scr[...] = jnp.zeros(acc_scr.shape, jnp.float32)

    # Fused qkv projection on the kv-tile patches; keep the k and v lane slices.
    qkv_k = (jnp.dot(xk_ref[0], w_qkv_ref[...],
                     preferred_element_type=jnp.float32) + b_qkv_ref[...])
    k = qkv_k[:, qk_dim:2 * qk_dim].astype(jnp.bfloat16)
    v = qkv_k[:, 2 * qk_dim:].astype(jnp.bfloat16)

    # Scores: contract the last dims of q and k (no explicit k transpose);
    # q already carries the 1/sqrt(qk) scale.
    s = jax.lax.dot_general(q_scr[...], k, (((1,), (1,)), ((), ())),
                            preferred_element_type=jnp.float32)   # (TQ, TK)

    if n_padded != n_valid:
        # Mask padded kv tokens (code only emitted when padding exists).
        col = jax.lax.broadcasted_iota(jnp.int32, s.shape, 1) + ki * tk
        s = jnp.where(col < n_valid, s, -1e30)

    # Online-softmax (flash) update, f32.
    m_new = jnp.maximum(m_scr[...], jnp.max(s, axis=-1, keepdims=True))
    alpha = jnp.exp(m_scr[...] - m_new)
    p = jnp.exp(s - m_new)
    l_scr[...] = alpha * l_scr[...] + jnp.sum(p, axis=-1, keepdims=True)
    acc_scr[...] = alpha * acc_scr[...] + jnp.dot(
        p.astype(jnp.bfloat16), v, preferred_element_type=jnp.float32)
    m_scr[...] = m_new

    @pl.when(ki == nk - 1)
    def _finalize():
        # Deferred softmax normalization: one EUP approx reciprocal per token.
        # Its per-token relative scale error is (up to the eps term) removed by
        # the scale-invariant LayerNorm below — approximate, not exact, but
        # numerically negligible at eps=1e-6.
        y = acc_scr[...] * pl.reciprocal(l_scr[...], approx=True)

        # LayerNorm over v_dim (eps = 1e-6), f32.
        mu = jnp.mean(y, axis=-1, keepdims=True)
        var = jnp.mean((y - mu) * (y - mu), axis=-1, keepdims=True)
        yn = (y - mu) * jax.lax.rsqrt(var + eps)
        yn = yn * gamma_ref[...] + beta_ref[...]

        # ConvTranspose2d(v, OC, 2, 2) == per-token matmul to (OC, 2, 2) lanes.
        o = (jnp.dot(yn.astype(jnp.bfloat16), w_o_ref[...],
                     preferred_element_type=jnp.float32) + b_o_ref[...])

        # Exact GELU (erf form, matches nn.GELU() default).
        # TODO(synk): tanh-approx GELU would move this onto the EUP slot, but
        # only if the accuracy budget allows deviating from exact nn.GELU().
        out_ref[0] = 0.5 * o * (1.0 + jax.lax.erf(o * 0.7071067811865476))


def _round_up(x, m):
    return (x + m - 1) // m * m


def bottom_forward(x, params, *, qk_dim, v_dim, out_channels, max_tile=256):
    """x: (B, C, H, W) float32 (NCHW, like PyTorch). Returns (B, OC, H, W)."""
    B, C, H, W = x.shape
    assert H % 2 == 0 and W % 2 == 0, "stride-2 2x2 conv requires even H, W"
    Hp, Wp = H // 2, W // 2
    N = Hp * Wp
    F = C * 4
    D = 2 * qk_dim + v_dim
    OC = out_channels
    OC4 = OC * 4
    scale = 1.0 / qk_dim ** 0.5

    # Flash tiles (tq == tk), sublane-aligned; token count padded to the tile.
    T = min(max_tile, _round_up(N, 8))
    Npad = _round_up(N, T)
    nq = Npad // T
    nk = Npad // T

    # --- parameter prep (tiny, fuses under jit): fold the attention scale into
    # the q columns of the fused qkv weight/bias; cast MXU operands to bf16.
    w_qkv = params["w_qkv"].astype(jnp.float32)                 # (F, D)
    b_qkv = params["b_qkv"].astype(jnp.float32)                 # (1, D)
    col_scale = jnp.concatenate(
        [jnp.full((qk_dim,), scale, jnp.float32),
         jnp.ones((D - qk_dim,), jnp.float32)])
    w_qkv_s = (w_qkv * col_scale).astype(jnp.bfloat16)
    b_qkv_s = b_qkv * col_scale
    gamma = params["gamma"].astype(jnp.float32).reshape(1, v_dim)
    beta = params["beta"].astype(jnp.float32).reshape(1, v_dim)
    w_o = params["w_o"].astype(jnp.bfloat16)                    # (V, OC*4)
    b_o = params["b_o"].astype(jnp.float32).reshape(1, OC4)

    # --- glue: non-overlapping 2x2 patches, feature order (c, kh, kw); pad the
    # token axis to the tile (thin XLA reshape/transpose outside the kernel).
    xp = x.reshape(B, C, Hp, 2, Wp, 2).transpose(0, 2, 4, 1, 3, 5)
    xp = xp.reshape(B, N, F)
    if Npad != N:
        xp = jnp.pad(xp, ((0, 0), (0, Npad - N), (0, 0)))
    xp = xp.astype(jnp.bfloat16)

    # VMEM budget from the actual tiles (each BlockSpec input double-buffered),
    # with headroom, clamped to what every generation can grant.
    vmem = (2 * 2 * T * F * 2                                    # xq + xk tiles
            + 2 * T * OC4 * 4                                    # output tile
            + 2 * (F * D * 2 + D * 4 + 2 * v_dim * 4
                   + v_dim * OC4 * 2 + OC4 * 4)                  # weights/biases
            + T * 128 * 2 + 2 * T * 128 * 4
            + T * max(v_dim, 128) * 4                            # scratch
            + 2 * T * T * 4)                                     # score/prob tile
    vmem_limit = int(min(max(4 * vmem, 8 << 20), 64 << 20))

    kernel = functools.partial(
        _bottom_kernel, qk_dim=qk_dim, n_valid=N, n_padded=Npad, tk=T, eps=1e-6)

    out = pl.pallas_call(
        kernel,
        out_shape=jax.ShapeDtypeStruct((B, Npad, OC4), jnp.float32),
        grid_spec=pltpu.PrefetchScalarGridSpec(
            num_scalar_prefetch=0,
            grid=(B, nq, nk),
            in_specs=[
                pl.BlockSpec((1, T, F), lambda b, qi, ki: (b, qi, 0)),  # q patches
                pl.BlockSpec((1, T, F), lambda b, qi, ki: (b, ki, 0)),  # kv patches
                pl.BlockSpec((F, D), lambda b, qi, ki: (0, 0)),         # w_qkv
                pl.BlockSpec((1, D), lambda b, qi, ki: (0, 0)),         # b_qkv
                pl.BlockSpec((1, v_dim), lambda b, qi, ki: (0, 0)),     # gamma
                pl.BlockSpec((1, v_dim), lambda b, qi, ki: (0, 0)),     # beta
                pl.BlockSpec((v_dim, OC4), lambda b, qi, ki: (0, 0)),   # w_o
                pl.BlockSpec((1, OC4), lambda b, qi, ki: (0, 0)),       # b_o
            ],
            out_specs=pl.BlockSpec((1, T, OC4), lambda b, qi, ki: (b, qi, 0)),
            scratch_shapes=[
                pltpu.VMEM((T, qk_dim), jnp.bfloat16),   # q tile (pre-scaled)
                pltpu.VMEM((T, 1), jnp.float32),         # running max
                pltpu.VMEM((T, 1), jnp.float32),         # running sum
                pltpu.VMEM((T, v_dim), jnp.float32),     # output accumulator
            ],
        ),
        compiler_params=pltpu.CompilerParams(
            dimension_semantics=("parallel", "parallel", "arbitrary"),
            vmem_limit_bytes=vmem_limit),
    )(xp, xp, w_qkv_s, b_qkv_s, gamma, beta, w_o, b_o)

    # --- glue: drop padded tokens, scatter each token's (OC, 2, 2) block back.
    o = out[:, :N, :].reshape(B, Hp, Wp, OC, 2, 2).transpose(0, 3, 1, 4, 2, 5)
    return o.reshape(B, OC, H, W)


def bottom_reference(x, params, *, qk_dim, v_dim, out_channels):
    """Pure-JAX f32 mirror of the PyTorch forward, for verification."""
    B, C, H, W = x.shape
    Hp, Wp = H // 2, W // 2
    N = Hp * Wp
    xp = x.reshape(B, C, Hp, 2, Wp, 2).transpose(0, 2, 4, 1, 3, 5)
    xp = xp.reshape(B, N, C * 4)
    qkv = xp @ params["w_qkv"] + params["b_qkv"]
    q, k, v = (qkv[..., :qk_dim], qkv[..., qk_dim:2 * qk_dim],
               qkv[..., 2 * qk_dim:])
    s = jnp.einsum("bnd,bmd->bnm", q, k) * (1.0 / qk_dim ** 0.5)
    p = jax.nn.softmax(s, axis=-1)
    y = jnp.einsum("bnm,bmd->bnd", p, v)
    mu = jnp.mean(y, axis=-1, keepdims=True)
    var = jnp.mean((y - mu) ** 2, axis=-1, keepdims=True)
    yn = (y - mu) * jax.lax.rsqrt(var + 1e-6)
    yn = yn * params["gamma"] + params["beta"]
    o = yn @ params["w_o"] + params["b_o"]
    o = jax.nn.gelu(o, approximate=False)
    o = o.reshape(B, Hp, Wp, out_channels, 2, 2).transpose(0, 3, 1, 4, 2, 5)
    return o.reshape(B, out_channels, H, W)


if __name__ == "__main__":
    # Small shapes consistent with the module.
    B, C, H, W = 2, 4, 16, 16
    QK, V, OC = 8, 16, 4
    D = 2 * QK + V

    key = jax.random.PRNGKey(0)
    kx, k1, k2, k3, k4, k5, k6 = jax.random.split(key, 7)

    x = jax.random.normal(kx, (B, C, H, W), dtype=jnp.float32)

    # Deterministic synthetic parameters in PyTorch layout, flattened:
    # Conv2d weight (D, C, 2, 2) -> (C*4, D); ConvTranspose2d weight
    # (V, OC, 2, 2) -> (V, OC*4); transposed-conv bias repeated over the 2x2
    # kernel positions in (oc, kh, kw) order.
    w_qkv = 0.1 * jax.random.normal(k1, (D, C, 2, 2), dtype=jnp.float32)
    w_qkv = w_qkv.reshape(D, C * 4).T            # (C*4, D)
    b_qkv = 0.1 * jax.random.normal(k2, (1, D), dtype=jnp.float32)
    gamma = 1.0 + 0.1 * jax.random.normal(k3, (1, V), dtype=jnp.float32)
    beta = 0.1 * jax.random.normal(k4, (1, V), dtype=jnp.float32)
    w_o = 0.1 * jax.random.normal(k5, (V, OC, 2, 2), dtype=jnp.float32)
    w_o = w_o.reshape(V, OC * 4)                 # (V, OC*4)
    b_oc = 0.1 * jax.random.normal(k6, (OC,), dtype=jnp.float32)
    b_o = jnp.repeat(b_oc, 4).reshape(1, OC * 4)

    params = {"w_qkv": w_qkv, "b_qkv": b_qkv, "gamma": gamma, "beta": beta,
              "w_o": w_o, "b_o": b_o}

    fwd = jax.jit(functools.partial(
        bottom_forward, qk_dim=QK, v_dim=V, out_channels=OC))
    out = jax.block_until_ready(fwd(x, params))

    ref = bottom_reference(x, params, qk_dim=QK, v_dim=V, out_channels=OC)
    assert out.shape == (B, OC, H, W)
    # bf16 MXU operands with f32 accumulation: typical |err| ~3e-3 vs the pure
    # f32 reference (the LayerNorm amplifies attention-stage rounding).
    max_err = jnp.max(jnp.abs(out - ref))
    mean_err = jnp.mean(jnp.abs(out - ref))
    assert max_err < 5e-2, f"max abs err {max_err} vs f32 reference"
    assert mean_err < 1e-2, f"mean abs err {mean_err} vs f32 reference"

    print("KERNEL_OK")
</pallas_src>

<mosaic_0001>
module attributes {stable_mosaic.version = 11 : i64} {
  func.func @_bottom_kernel(%arg0: i32, %arg1: i32, %arg2: i32, %arg3: memref<1x64x16xbf16, #tpu.memory_space<vmem>>, %arg4: memref<1x64x16xbf16, #tpu.memory_space<vmem>>, %arg5: memref<16x32xbf16, #tpu.memory_space<vmem>>, %arg6: memref<1x32xf32, #tpu.memory_space<vmem>>, %arg7: memref<1x16xf32, #tpu.memory_space<vmem>>, %arg8: memref<1x16xf32, #tpu.memory_space<vmem>>, %arg9: memref<16x16xbf16, #tpu.memory_space<vmem>>, %arg10: memref<1x16xf32, #tpu.memory_space<vmem>>, %arg11: memref<1x64x16xf32, #tpu.memory_space<vmem>>, %arg12: memref<64x8xbf16, #tpu.memory_space<vmem>>, %arg13: memref<64x1xf32, #tpu.memory_space<vmem>>, %arg14: memref<64x1xf32, #tpu.memory_space<vmem>>, %arg15: memref<64x16xf32, #tpu.memory_space<vmem>>) attributes {dimension_semantics = [#tpu.dimension_semantics<parallel>, #tpu.dimension_semantics<parallel>, #tpu.dimension_semantics<arbitrary>], iteration_bounds = array<i64: 2, 1, 1>, scalar_prefetch = 0 : i64, scratch_operands = 4 : i64, tpu.core_type = #tpu.core_type<tc>, window_params = [{transform_indices = @transform_0, window_bounds = array<i64: 1, 64, 16>}, {transform_indices = @transform_1, window_bounds = array<i64: 1, 64, 16>}, {pipeline_mode = #tpu.pipeline_mode<synchronous>, transform_indices = @transform_2, window_bounds = array<i64: 16, 32>}, {pipeline_mode = #tpu.pipeline_mode<synchronous>, transform_indices = @transform_3, window_bounds = array<i64: 1, 32>}, {pipeline_mode = #tpu.pipeline_mode<synchronous>, transform_indices = @transform_4, window_bounds = array<i64: 1, 16>}, {pipeline_mode = #tpu.pipeline_mode<synchronous>, transform_indices = @transform_5, window_bounds = array<i64: 1, 16>}, {pipeline_mode = #tpu.pipeline_mode<synchronous>, transform_indices = @transform_6, window_bounds = array<i64: 16, 16>}, {pipeline_mode = #tpu.pipeline_mode<synchronous>, transform_indices = @transform_7, window_bounds = array<i64: 1, 16>}, {transform_indices = @transform_8, window_bounds = array<i64: 1, 64, 16>}]} {
    %c0_i32 = arith.constant 0 : i32
    %0 = arith.cmpi eq, %arg2, %c0_i32 : i32
    %1 = arith.extui %0 : i1 to i32
    %c0_i32_0 = arith.constant 0 : i32
    %2 = arith.cmpi ne, %1, %c0_i32_0 : i32
    scf.if %2 {
      %c0_29 = arith.constant 0 : index
      %c0_30 = arith.constant 0 : index
      %c0_31 = arith.constant 0 : index
      %43 = vector.load %arg3[%c0_29, %c0_30, %c0_31] : memref<1x64x16xbf16, #tpu.memory_space<vmem>>, vector<1x64x16xbf16>
      %44 = vector.shape_cast %43 : vector<1x64x16xbf16> to vector<64x16xbf16>
      %c0_32 = arith.constant 0 : index
      %c0_33 = arith.constant 0 : index
      %45 = vector.load %arg5[%c0_32, %c0_33] : memref<16x32xbf16, #tpu.memory_space<vmem>>, vector<16x32xbf16>
      %cst_34 = arith.constant dense<0.000000e+00> : vector<64x32xf32>
      %46 = tpu.matmul %44, %45, %cst_34 {dimension_numbers = #tpu.dot_dimension_numbers<[1], [0], [0], [1], [0, 0, 1, 1], [], []>} : vector<64x16xbf16>, vector<16x32xbf16>, vector<64x32xf32> -> vector<64x32xf32>
      %c0_35 = arith.constant 0 : index
      %c0_36 = arith.constant 0 : index
      %47 = vector.load %arg6[%c0_35, %c0_36] : memref<1x32xf32, #tpu.memory_space<vmem>>, vector<1x32xf32>
      %48 = vector.broadcast %47 : vector<1x32xf32> to vector<64x32xf32>
      %49 = arith.addf %46, %48 : vector<64x32xf32>
      %50 = vector.extract_strided_slice %49 {offsets = [0, 0], sizes = [64, 8], strides = [1, 1]} : vector<64x32xf32> to vector<64x8xf32>
      %51 = arith.truncf %50 : vector<64x8xf32> to vector<64x8xbf16>
      %c0_37 = arith.constant 0 : index
      %c0_38 = arith.constant 0 : index
      %52 = vector.load %arg12[%c0_37, %c0_38] : memref<64x8xbf16, #tpu.memory_space<vmem>>, vector<64x8xbf16>
      tpu.vector_store %arg12[%c0_37, %c0_38], %51 {strides = array<i32>} : memref<64x8xbf16, #tpu.memory_space<vmem>>, vector<64x8xbf16>,
      %cst_39 = arith.constant 0xFF800000 : f32
      %53 = vector.broadcast %cst_39 : f32 to vector<64x1xf32>
      %c0_40 = arith.constant 0 : index
      %c0_41 = arith.constant 0 : index
      %54 = vector.load %arg13[%c0_40, %c0_41] : memref<64x1xf32, #tpu.memory_space<vmem>>, vector<64x1xf32>
      tpu.vector_store %arg13[%c0_40, %c0_41], %53 {strides = array<i32>} : memref<64x1xf32, #tpu.memory_space<vmem>>, vector<64x1xf32>,
      %cst_42 = arith.constant 0.000000e+00 : f32
      %55 = vector.broadcast %cst_42 : f32 to vector<64x1xf32>
      %c0_43 = arith.constant 0 : index
      %c0_44 = arith.constant 0 : index
      %56 = vector.load %arg14[%c0_43, %c0_44] : memref<64x1xf32, #tpu.memory_space<vmem>>, vector<64x1xf32>
      tpu.vector_store %arg14[%c0_43, %c0_44], %55 {strides = array<i32>} : memref<64x1xf32, #tpu.memory_space<vmem>>, vector<64x1xf32>,
      %cst_45 = arith.constant 0.000000e+00 : f32
      %57 = vector.broadcast %cst_45 : f32 to vector<64x16xf32>
      %c0_46 = arith.constant 0 : index
      %c0_47 = arith.constant 0 : index
      %58 = vector.load %arg15[%c0_46, %c0_47] : memref<64x16xf32, #tpu.memory_space<vmem>>, vector<64x16xf32>
      tpu.vector_store %arg15[%c0_46, %c0_47], %57 {strides = array<i32>} : memref<64x16xf32, #tpu.memory_space<vmem>>, vector<64x16xf32>,
    } else {
    }
    %c0 = arith.constant 0 : index
    %c0_1 = arith.constant 0 : index
    %c0_2 = arith.constant 0 : index
    %3 = vector.load %arg4[%c0, %c0_1, %c0_2] : memref<1x64x16xbf16, #tpu.memory_space<vmem>>, vector<1x64x16xbf16>
    %4 = vector.shape_cast %3 : vector<1x64x16xbf16> to vector<64x16xbf16>
    %c0_3 = arith.constant 0 : index
    %c0_4 = arith.constant 0 : index
    %5 = vector.load %arg5[%c0_3, %c0_4] : memref<16x32xbf16, #tpu.memory_space<vmem>>, vector<16x32xbf16>
    %cst = arith.constant dense<0.000000e+00> : vector<64x32xf32>
    %6 = tpu.matmul %4, %5, %cst {dimension_numbers = #tpu.dot_dimension_numbers<[1], [0], [0], [1], [0, 0, 1, 1], [], []>} : vector<64x16xbf16>, vector<16x32xbf16>, vector<64x32xf32> -> vector<64x32xf32>
    %c0_5 = arith.constant 0 : index
    %c0_6 = arith.constant 0 : index
    %7 = vector.load %arg6[%c0_5, %c0_6] : memref<1x32xf32, #tpu.memory_space<vmem>>, vector<1x32xf32>
    %8 = vector.broadcast %7 : vector<1x32xf32> to vector<64x32xf32>
    %9 = arith.addf %6, %8 : vector<64x32xf32>
    %10 = vector.extract_strided_slice %9 {offsets = [0, 8], sizes = [64, 8], strides = [1, 1]} : vector<64x32xf32> to vector<64x8xf32>
    %11 = arith.truncf %10 : vector<64x8xf32> to vector<64x8xbf16>
    %12 = vector.extract_strided_slice %9 {offsets = [0, 16], sizes = [64, 16], strides = [1, 1]} : vector<64x32xf32> to vector<64x16xf32>
    %13 = arith.truncf %12 : vector<64x16xf32> to vector<64x16xbf16>
    %c0_7 = arith.constant 0 : index
    %c0_8 = arith.constant 0 : index
    %14 = vector.load %arg12[%c0_7, %c0_8] : memref<64x8xbf16, #tpu.memory_space<vmem>>, vector<64x8xbf16>
    %cst_9 = arith.constant dense<0.000000e+00> : vector<64x64xf32>
    %15 = tpu.matmul %14, %11, %cst_9 {dimension_numbers = #tpu.dot_dimension_numbers<[1], [1], [0], [0], [0, 0, 1, 0], [], []>} : vector<64x8xbf16>, vector<64x8xbf16>, vector<64x64xf32> -> vector<64x64xf32>
    %c0_10 = arith.constant 0 : index
    %c0_11 = arith.constant 0 : index
    %16 = vector.load %arg13[%c0_10, %c0_11] : memref<64x1xf32, #tpu.memory_space<vmem>>, vector<64x1xf32>
    %cst_12 = arith.constant dense<0xFF800000> : vector<64xf32>
    %17 = vector.multi_reduction <maximumf>, %15, %cst_12 [1] : vector<64x64xf32> to vector<64xf32>
    %18 = vector.shape_cast %17 : vector<64xf32> to vector<64x1xf32>
    %19 = arith.maximumf %16, %18 : vector<64x1xf32>
    %c0_13 = arith.constant 0 : index
    %c0_14 = arith.constant 0 : index
    %20 = vector.load %arg13[%c0_13, %c0_14] : memref<64x1xf32, #tpu.memory_space<vmem>>, vector<64x1xf32>
    %21 = arith.subf %20, %19 : vector<64x1xf32>
    %22 = math.exp %21 : vector<64x1xf32>
    %23 = vector.broadcast %19 : vector<64x1xf32> to vector<64x64xf32>
    %24 = arith.subf %15, %23 : vector<64x64xf32>
    %25 = math.exp %24 : vector<64x64xf32>
    %c0_15 = arith.constant 0 : index
    %c0_16 = arith.constant 0 : index
    %26 = vector.load %arg14[%c0_15, %c0_16] : memref<64x1xf32, #tpu.memory_space<vmem>>, vector<64x1xf32>
    %27 = arith.mulf %22, %26 : vector<64x1xf32>
    %cst_17 = arith.constant dense<0.000000e+00> : vector<64xf32>
    %28 = vector.multi_reduction <add>, %25, %cst_17 [1] : vector<64x64xf32> to vector<64xf32>
    %29 = vector.shape_cast %28 : vector<64xf32> to vector<64x1xf32>
    %30 = arith.addf %27, %29 : vector<64x1xf32>
    %c0_18 = arith.constant 0 : index
    %c0_19 = arith.constant 0 : index
    %31 = vector.load %arg14[%c0_18, %c0_19] : memref<64x1xf32, #tpu.memory_space<vmem>>, vector<64x1xf32>
    tpu.vector_store %arg14[%c0_18, %c0_19], %30 {strides = array<i32>} : memref<64x1xf32, #tpu.memory_space<vmem>>, vector<64x1xf32>,
    %c0_20 = arith.constant 0 : index
    %c0_21 = arith.constant 0 : index
    %32 = vector.load %arg15[%c0_20, %c0_21] : memref<64x16xf32, #tpu.memory_space<vmem>>, vector<64x16xf32>
    %33 = vector.broadcast %22 : vector<64x1xf32> to vector<64x16xf32>
    %34 = arith.mulf %33, %32 : vector<64x16xf32>
    %35 = arith.truncf %25 : vector<64x64xf32> to vector<64x64xbf16>
    %cst_22 = arith.constant dense<0.000000e+00> : vector<64x16xf32>
    %36 = tpu.matmul %35, %13, %cst_22 {dimension_numbers = #tpu.dot_dimension_numbers<[1], [0], [0], [1], [0, 0, 1, 1], [], []>} : vector<64x64xbf16>, vector<64x16xbf16>, vector<64x16xf32> -> vector<64x16xf32>
    %37 = arith.addf %34, %36 : vector<64x16xf32>
    %c0_23 = arith.constant 0 : index
    %c0_24 = arith.constant 0 : index
    %38 = vector.load %arg15[%c0_23, %c0_24] : memref<64x16xf32, #tpu.memory_space<vmem>>, vector<64x16xf32>
    tpu.vector_store %arg15[%c0_23, %c0_24], %37 {strides = array<i32>} : memref<64x16xf32, #tpu.memory_space<vmem>>, vector<64x16xf32>,
    %c0_25 = arith.constant 0 : index
    %c0_26 = arith.constant 0 : index
    %39 = vector.load %arg13[%c0_25, %c0_26] : memref<64x1xf32, #tpu.memory_space<vmem>>, vector<64x1xf32>
    tpu.vector_store %arg13[%c0_25, %c0_26], %19 {strides = array<i32>} : memref<64x1xf32, #tpu.memory_space<vmem>>, vector<64x1xf32>,
    %c0_i32_27 = arith.constant 0 : i32
    %40 = arith.cmpi eq, %arg2, %c0_i32_27 : i32
    %41 = arith.extui %40 : i1 to i32
    %c0_i32_28 = arith.constant 0 : i32
    %42 = arith.cmpi ne, %41, %c0_i32_28 : i32
    scf.if %42 {
      %c0_29 = arith.constant 0 : index
      %c0_30 = arith.constant 0 : index
      %43 = vector.load %arg15[%c0_29, %c0_30] : memref<64x16xf32, #tpu.memory_space<vmem>>, vector<64x16xf32>
      %c0_31 = arith.constant 0 : index
      %c0_32 = arith.constant 0 : index
      %44 = vector.load %arg14[%c0_31, %c0_32] : memref<64x1xf32, #tpu.memory_space<vmem>>, vector<64x1xf32>
      %45 = tpu.reciprocal %44 {approx = true} : vector<64x1xf32> -> vector<64x1xf32>
      %46 = vector.broadcast %45 : vector<64x1xf32> to vector<64x16xf32>
      %47 = arith.mulf %43, %46 : vector<64x16xf32>
      %cst_33 = arith.constant dense<0.000000e+00> : vector<64xf32>
      %48 = vector.multi_reduction <add>, %47, %cst_33 [1] : vector<64x16xf32> to vector<64xf32>
      %49 = vector.shape_cast %48 : vector<64xf32> to vector<64x1xf32>
      %cst_34 = arith.constant 1.600000e+01 : f32
      %50 = vector.broadcast %cst_34 : f32 to vector<64x1xf32>
      %51 = arith.divf %49, %50 : vector<64x1xf32>
      %52 = vector.broadcast %51 : vector<64x1xf32> to vector<64x16xf32>
      %53 = arith.subf %47, %52 : vector<64x16xf32>
      %54 = vector.broadcast %51 : vector<64x1xf32> to vector<64x16xf32>
      %55 = arith.subf %47, %54 : vector<64x16xf32>
      %56 = arith.mulf %53, %55 : vector<64x16xf32>
      %cst_35 = arith.constant dense<0.000000e+00> : vector<64xf32>
      %57 = vector.multi_reduction <add>, %56, %cst_35 [1] : vector<64x16xf32> to vector<64xf32>
      %58 = vector.shape_cast %57 : vector<64xf32> to vector<64x1xf32>
      %cst_36 = arith.constant 1.600000e+01 : f32
      %59 = vector.broadcast %cst_36 : f32 to vector<64x1xf32>
      %60 = arith.divf %58, %59 : vector<64x1xf32>
      %61 = vector.broadcast %51 : vector<64x1xf32> to vector<64x16xf32>
      %62 = arith.subf %47, %61 : vector<64x16xf32>
      %cst_37 = arith.constant 9.99999997E-7 : f32
      %63 = vector.broadcast %cst_37 : f32 to vector<64x1xf32>
      %64 = arith.addf %60, %63 : vector<64x1xf32>
      %65 = math.rsqrt %64 : vector<64x1xf32>
      %66 = vector.broadcast %65 : vector<64x1xf32> to vector<64x16xf32>
      %67 = arith.mulf %62, %66 : vector<64x16xf32>
      %c0_38 = arith.constant 0 : index
      %c0_39 = arith.constant 0 : index
      %68 = vector.load %arg7[%c0_38, %c0_39] : memref<1x16xf32, #tpu.memory_space<vmem>>, vector<1x16xf32>
      %69 = vector.broadcast %68 : vector<1x16xf32> to vector<64x16xf32>
      %70 = arith.mulf %67, %69 : vector<64x16xf32>
      %c0_40 = arith.constant 0 : index
      %c0_41 = arith.constant 0 : index
      %71 = vector.load %arg8[%c0_40, %c0_41] : memref<1x16xf32, #tpu.memory_space<vmem>>, vector<1x16xf32>
      %72 = vector.broadcast %71 : vector<1x16xf32> to vector<64x16xf32>
      %73 = arith.addf %70, %72 : vector<64x16xf32>
      %74 = arith.truncf %73 : vector<64x16xf32> to vector<64x16xbf16>
      %c0_42 = arith.constant 0 : index
      %c0_43 = arith.constant 0 : index
      %75 = vector.load %arg9[%c0_42, %c0_43] : memref<16x16xbf16, #tpu.memory_space<vmem>>, vector<16x16xbf16>
      %cst_44 = arith.constant dense<0.000000e+00> : vector<64x16xf32>
      %76 = tpu.matmul %74, %75, %cst_44 {dimension_numbers = #tpu.dot_dimension_numbers<[1], [0], [0], [1], [0, 0, 1, 1], [], []>} : vector<64x16xbf16>, vector<16x16xbf16>, vector<64x16xf32> -> vector<64x16xf32>
      %c0_45 = arith.constant 0 : index
      %c0_46 = arith.constant 0 : index
      %77 = vector.load %arg10[%c0_45, %c0_46] : memref<1x16xf32, #tpu.memory_space<vmem>>, vector<1x16xf32>
      %78 = vector.broadcast %77 : vector<1x16xf32> to vector<64x16xf32>
      %79 = arith.addf %76, %78 : vector<64x16xf32>
      %cst_47 = arith.constant 5.000000e-01 : f32
      %80 = vector.broadcast %cst_47 : f32 to vector<64x16xf32>
      %81 = arith.mulf %80, %79 : vector<64x16xf32>
      %cst_48 = arith.constant 0.707106769 : f32
      %82 = vector.broadcast %cst_48 : f32 to vector<64x16xf32>
      %83 = arith.mulf %79, %82 : vector<64x16xf32>
      %84 = math.erf %83 : vector<64x16xf32>
      %cst_49 = arith.constant 1.000000e+00 : f32
      %85 = vector.broadcast %cst_49 : f32 to vector<64x16xf32>
      %86 = arith.addf %85, %84 : vector<64x16xf32>
      %87 = arith.mulf %81, %86 : vector<64x16xf32>
      %c0_50 = arith.constant 0 : index
      %c0_51 = arith.constant 0 : index
      %c0_52 = arith.constant 0 : index
      %88 = vector.load %arg11[%c0_50, %c0_51, %c0_52] : memref<1x64x16xf32, #tpu.memory_space<vmem>>, vector<1x64x16xf32>
      %89 = vector.shape_cast %88 : vector<1x64x16xf32> to vector<64x16xf32>
      %90 = vector.shape_cast %87 : vector<64x16xf32> to vector<1x64x16xf32>
      tpu.vector_store %arg11[%c0_50, %c0_51, %c0_52], %90 {strides = array<i32>} : memref<1x64x16xf32, #tpu.memory_space<vmem>>, vector<1x64x16xf32>,
    } else {
    }
    return
  }
  func.func @transform_0(%arg0: i32, %arg1: i32, %arg2: i32) -> (i32, i32, i32) {
    %c0_i32 = arith.constant 0 : i32
    %c0_i32_0 = arith.constant 0 : i32
    return %arg0, %arg1, %c0_i32 : i32, i32, i32
  }
  func.func @transform_1(%arg0: i32, %arg1: i32, %arg2: i32) -> (i32, i32, i32) {
    %c0_i32 = arith.constant 0 : i32
    %c0_i32_0 = arith.constant 0 : i32
    return %arg0, %arg2, %c0_i32 : i32, i32, i32
  }
  func.func @transform_2(%arg0: i32, %arg1: i32, %arg2: i32) -> (i32, i32) {
    %c0_i32 = arith.constant 0 : i32
    %c0_i32_0 = arith.constant 0 : i32
    %c0_i32_1 = arith.constant 0 : i32
    return %c0_i32, %c0_i32_0 : i32, i32
  }
  func.func @transform_3(%arg0: i32, %arg1: i32, %arg2: i32) -> (i32, i32) {
    %c0_i32 = arith.constant 0 : i32
    %c0_i32_0 = arith.constant 0 : i32
    %c0_i32_1 = arith.constant 0 : i32
    return %c0_i32, %c0_i32_0 : i32, i32
  }
  func.func @transform_4(%arg0: i32, %arg1: i32, %arg2: i32) -> (i32, i32) {
    %c0_i32 = arith.constant 0 : i32
    %c0_i32_0 = arith.constant 0 : i32
    %c0_i32_1 = arith.constant 0 : i32
    return %c0_i32, %c0_i32_0 : i32, i32
  }
  func.func @transform_5(%arg0: i32, %arg1: i32, %arg2: i32) -> (i32, i32) {
    %c0_i32 = arith.constant 0 : i32
    %c0_i32_0 = arith.constant 0 : i32
    %c0_i32_1 = arith.constant 0 : i32
    return %c0_i32, %c0_i32_0 : i32, i32
  }
  func.func @transform_6(%arg0: i32, %arg1: i32, %arg2: i32) -> (i32, i32) {
    %c0_i32 = arith.constant 0 : i32
    %c0_i32_0 = arith.constant 0 : i32
    %c0_i32_1 = arith.constant 0 : i32
    return %c0_i32, %c0_i32_0 : i32, i32
  }
  func.func @transform_7(%arg0: i32, %arg1: i32, %arg2: i32) -> (i32, i32) {
    %c0_i32 = arith.constant 0 : i32
    %c0_i32_0 = arith.constant 0 : i32
    %c0_i32_1 = arith.constant 0 : i32
    return %c0_i32, %c0_i32_0 : i32, i32
  }
  func.func @transform_8(%arg0: i32, %arg1: i32, %arg2: i32) -> (i32, i32, i32) {
    %c0_i32 = arith.constant 0 : i32
    %c0_i32_0 = arith.constant 0 : i32
    return %arg0, %arg1, %c0_i32 : i32, i32, i32
  }
}

</mosaic_0001>

<bundles_post_ra>
// kernel: mul.9
= control target key start
LH: loop header
LB: loop body
LE: loop exit
PB: predicated region body
PF: predicated region fallthrough
CT: control target
= control target key end

     0   :  { %s34_s0 = inlined_call_operand.vmem [shape: f32[1,32], index: 0, kind: input, shape index: {}]   ;;  %s35_s1 = inlined_call_operand.vmem [shape: f32[1,32], index: 1, kind: input, shape index: {}]   ;;  %s36_s2 = inlined_call_operand.vmem [shape: f32[1,32], index: 2, kind: output, shape index: {}]  }
   0x1   :  { %v3_v0 = vld [vmem:[%s34_s0] sm:$0x1] }
   0x2   :  { %v4_v1 = vld [vmem:[%s35_s1] sm:$0x1] }
   0x3   :  { %v7_v2 = vmul.f32 %v4_v1, %v3_v0 }
   0x5   :  { %9 = vst [vmem:[%s36_s2] sm:$0x1] %v7_v2 }

// kernel: bottom_forward.1
= control target key start
LH: loop header
LB: loop body
LE: loop exit
PB: predicated region body
PF: predicated region fallthrough
CT: control target
= control target key end

     0   :  { %s1945_s27 = smov 0   ;;  %s1947_s28 = smov 0   ;;  %s2324_s0 = inlined_call_operand.vmem [shape: bf16[2,64,16], index: 0, kind: input, shape index: {}, may-alias: {0,1}]   ;;  %s2325_s1 = inlined_call_operand.vmem [shape: bf16[2,64,16], index: 1, kind: input, shape index: {}, may-alias: {0,1}]   ;;  %s2326_s2 = inlined_call_operand.vmem [shape: bf16[16,32], index: 2, kind: input, shape index: {}]   ;;  %s2327_s3 = inlined_call_operand.vmem [shape: f32[1,32], index: 3, kind: input, shape index: {}]   ;;  %s2328_s4 = inlined_call_operand.vmem [shape: f32[1,16], index: 4, kind: input, shape index: {}]   ;;  %s2329_s5 = inlined_call_operand.vmem [shape: f32[1,16], index: 5, kind: input, shape index: {}]   ;;  %s2330_s6 = inlined_call_operand.vmem [shape: bf16[16,16], index: 6, kind: input, shape index: {}]   ;;  %s2331_s7 = inlined_call_operand.vmem [shape: f32[1,16], index: 7, kind: input, shape index: {}]   ;;  %s2332_s8 = inlined_call_operand.vmem [shape: f32[2,64,16], index: 8, kind: output, shape index: {}]  }
   0x1   :  { %s1949_s29 = smov 0  }
   0x2 LB: > { %s37_s30 = sadd.s32 1, %s1889_s28  ;;  %p1604_p0 = scmp.ge.s32.totalorder %s1893_s29, 1  ;;  %s1893_s29 = sphi %s1949_s29, %s18_s29   ;;  %s1889_s28 = sphi %s1947_s28, %s2334_s28   ;;  %s1885_s27 = sphi %s1945_s27, %s2333_s27  }
   0x3   : > { %p39_p1 = scmp.ge.s32.totalorder %s37_s30, 2  ;;  %p307_p2 = scmp.lt.s32.totalorder %s1893_s29, 3 }
   0x5   : > { %s2336_s30 = smov (%p39_p1, %s37_s30), 0  ;;  %p308_p3 = pnand %p1604_p0, %p307_p2 }
   0x6   : > { %v1780_v0 = vld [vmem:[%s2326_s2] sm:$0xff] (!%p308_p3)   ;;  %p359_p4 = scmp.lt.s32.totalorder (!%p308_p3), %s1885_s27, 1  ;;  %vm436_vm0 = vcmask (!%p308_p3), 130048   ;;  %s1895_s22 = smov (!%p308_p3), 120   ;;  %vm518_vm1 = vcmask (!%p308_p3), 64512   ;;  %vm523_vm2 = vcmask (!%p308_p3), 7168  }
   0x7   : > { %311 = sbr.rel (%p308_p3) target bundleno = 1758 (0x6de), region = 52  ;;  %v1785_v1 = vld [vmem:[%s2326_s2] sm:$0xff] (!%p308_p3)   ;;  %1693 = vmatprep.subr.bf16.mxu1 (!%p308_p3), %v1780_v0  ;;  %v1896_v63 = vmov (!%p308_p3), -inf   ;;  %vm787_vm3 = vcmask (!%p308_p3), 523264   ;;  %s1899_s23 = smov (!%p308_p3), 112  }
   0x8   : > { %1694 = vmatpush3.bf16.msra.mxu1 (!%p308_p3), %v1780_v0  ;;  %1683 = vmatprep.subr.bf16.mxu0 (!%p308_p3), %v1785_v1  ;;  %v1621_v11 = vld [vmem:[%s2327_s3] ss:$0 sm:$0xff] (!%p308_p3)  ;;  %524 = vst.msk [vmem:[#allocation3] sm:$0xff] (!%p308_p3), %vm523_vm2, %v1896_v63  ;;  %525 = vst.msk [vmem:[#allocation3 + $0x8] sm:$0xff] (!%p308_p3), %vm523_vm2, %v1896_v63 }
   0x9   : > { %1684 = vmatpush3.bf16.msra.mxu0 (!%p308_p3), %v1785_v1  ;;  %526 = vst.msk [vmem:[#allocation3 + $0x10] sm:$0xff] (!%p308_p3), %vm523_vm2, %v1896_v63  ;;  %527 = vst.msk [vmem:[#allocation3 + $0x18] sm:$0xff] (!%p308_p3), %vm523_vm2, %v1896_v63 }
   0xa   : > { %528 = vst.msk [vmem:[#allocation3 + $0x20] sm:$0xff] (!%p308_p3), %vm523_vm2, %v1896_v63  ;;  %529 = vst.msk [vmem:[#allocation3 + $0x28] sm:$0xff] (!%p308_p3), %vm523_vm2, %v1896_v63 }
   0xb   : > { %530 = vst.msk [vmem:[#allocation3 + $0x30] sm:$0xff] (!%p308_p3), %vm523_vm2, %v1896_v63  ;;  %531 = vst.msk [vmem:[#allocation3 + $0x38] sm:$0xff] (!%p308_p3), %vm523_vm2, %v1896_v63 }
   0xe   : > { %s2338_s27 = smov (!%p359_p4, %s1885_s27), 1 }
   0xf   : > { %s1649_s13 = sshll.u32 %s2338_s27, 5  ;;  %s1651_s14 = sshll.u32 %s2338_s27, 6 }
  0x10   : > { %s376_s16 = scalar_lea.vmem %s2325_s1, %s1649_s13  ;;  %s366_s19 = scalar_lea.vmem %s2324_s0, %s1649_s13 }
  0x11   : > { %v1781_v2 = vld [vmem:[%s376_s16] sm:$0xff]   ;;  %v1782_v3 = vld [vmem:[%s376_s16 + $0x8] sm:$0xff]   ;;  %v1783_v4 = vld [vmem:[%s376_s16 + $0x10] sm:$0xff]   ;;  %s2297_s17 = scalar_lea.vmem %s2332_s8, %s1651_s14 }
  0x12   : > { %1695 = vmatprep.mubr.msk.bf16.mxu1 %vm436_vm0, %v1781_v2  ;;  %v1786_v5 = vld [vmem:[%s366_s19] sm:$0xff]   ;;  %v1787_v6 = vld [vmem:[%s366_s19 + $0x8] sm:$0xff]   ;;  %v1788_v7 = vld [vmem:[%s366_s19 + $0x10] sm:$0xff]  }
  0x13   : > { %1696 = vmatmul.mubr.msk.bf16.vlgmr.msra.gmra.mrb[0].mxu1 %vm436_vm0, %v1782_v3  ;;  %1685 = vmatprep.mubr.msk.bf16.mxu0 %vm436_vm0, %v1786_v5  ;;  %v1784_v8 = vld [vmem:[%s376_s16 + $0x18] sm:$0xff]  }
  0x14   : > { %1699 = vmatprep.mubr.msk.bf16.mxu1 %vm436_vm0, %v1783_v4  ;;  %1686 = vmatmul.mubr.msk.bf16.vlgmr.msra.gmra.mrb[0].mxu0 %vm436_vm0, %v1787_v6  ;;  %v1789_v9 = vld [vmem:[%s366_s19 + $0x18] sm:$0xff]  }
  0x15   : > { %1689 = vmatprep.mubr.msk.bf16.mxu0 %vm436_vm0, %v1788_v7 }
  0x1b   : > { %1700 = vmatmul.mubr.msk.bf16.gmra.mrb[4].mxu1 %vm436_vm0, %v1784_v8 }
  0x1c   : > { %1690 = vmatmul.mubr.msk.bf16.gmra.mrb[4].mxu0 %vm436_vm0, %v1789_v9 }
  0xe6   : > { %v1697_v10 = vpop.f32.mrb[0].mxu1 }
  0xe7   : > { %v638_v12 = vpop.f32.mrb[1].mxu1  ;;  %v647_v14 = vadd.f32 %v1697_v10, %v1621_v11  ;;  %v1687_v21 = vpop.f32.mrb[0].mxu0 }
  0xe8   : > { %v1698_v13 = vpop.f32.mrb[2].mxu1  ;;  %v639_v17 = vadd.f32 %v1621_v11, %v638_v12  ;;  %v492_v23 = vadd.f32 %v1687_v21, %v1621_v11  ;;  %v483_v24 = vpop.f32.mrb[1].mxu0 }
  0xe9   : > { %v650_v15 = vadd.f32 %v1698_v13, %v1621_v11  ;;  %v641_v16 = vpop.f32.mrb[3].mxu1  ;;  %v484_v27 = vadd.f32 %v1621_v11, %v483_v24  ;;  %v1688_v28 = vpop.f32.mrb[2].mxu0 }
  0xea   : > { %v642_v18 = vadd.f32 %v1621_v11, %v641_v16  ;;  %v495_v31 = vadd.f32 %v1688_v28, %v1621_v11  ;;  %v486_v32 = vpop.f32.mrb[3].mxu0  ;;  %v1897_v16 = vmov 0  }
  0xeb   : > { %v1989_v19 = vpack.c.bf16 %v650_v15, %v647_v14  ;;  %v487_v35 = vadd.f32 %v1621_v11, %v486_v32  ;;  %1778 = vset.pattern.permute.xlu1 %v1897_v16  ;;  %1779 = vset.pattern.permute.xlu0 %v1897_v16  ;;  %v2104_v32 = vld [vmem:[#allocation3 + $0x20] sm:$0xff] }
  0xec   : > { %v1991_v20 = vpack.c.bf16 %v642_v18, %v639_v17  ;;  %v515_v37 = vpack.c.bf16 %v495_v31, %v492_v23  ;;  %v1898_v17 = vmov 0.0   ;;  %v2077_v18 = vld [vmem:[#allocation3] sm:$0xff]  ;;  %v2102_v31 = vld [vmem:[#allocation3 + $0x18] sm:$0xff] }
  0xed   : > { %v514_v39 = vpack.c.bf16 %v487_v35, %v484_v27  ;;  %532 = vst.msk [vmem:[#allocation4] sm:$0xff] %vm523_vm2, %v1898_v17  ;;  %533 = vst.msk [vmem:[#allocation4 + $0x8] sm:$0xff] %vm523_vm2, %v1898_v17 }
  0xee   : > { %681 = vrot.lane.b32.xlu0 %v1991_v20, %s1895_s22  ;;  %v1701_v22 = vpop.f32.mrb[4].mxu1  ;;  %520 = vst.msk [vmem:[#allocation2 + $0x8] sm:$0xff] %vm518_vm1, %v515_v37 }
  0xef   : > { %v663_v25 = vadd.f32 %v1701_v22, %v1621_v11  ;;  %v654_v26 = vpop.f32.mrb[5].mxu1  ;;  %v1691_v40 = vpop.f32.mrb[4].mxu0  ;;  %519 = vst.msk [vmem:[#allocation2] sm:$0xff] %vm518_vm1, %v514_v39  ;;  %v2079_v22 = vld [vmem:[#allocation3 + $0x8] sm:$0xff]  ;;  %v2118_v39 = vld [vmem:[#allocation3 + $0x30] sm:$0xff] }
  0xf0   : > { %v655_v29 = vadd.f32 %v1621_v11, %v654_v26  ;;  %v1702_v30 = vpop.f32.mrb[6].mxu1  ;;  %v508_v42 = vadd.f32 %v1691_v40, %v1621_v11  ;;  %v499_v43 = vpop.f32.mrb[5].mxu0  ;;  %534 = vst.msk [vmem:[#allocation4 + $0x10] sm:$0xff] %vm523_vm2, %v1898_v17  ;;  %535 = vst.msk [vmem:[#allocation4 + $0x18] sm:$0xff] %vm523_vm2, %v1898_v17  ;;  %v2120_v40 = vld [vmem:[#allocation3 + $0x28] sm:$0xff] }
  0xf1   : > { %v666_v33 = vadd.f32 %v1702_v30, %v1621_v11  ;;  %v657_v34 = vpop.f32.mrb[7].mxu1  ;;  %v500_v44 = vadd.f32 %v1621_v11, %v499_v43  ;;  %v1692_v45 = vpop.f32.mrb[6].mxu0  ;;  %536 = vst.msk [vmem:[#allocation4 + $0x20] sm:$0xff] %vm523_vm2, %v1898_v17  ;;  %537 = vst.msk [vmem:[#allocation4 + $0x28] sm:$0xff] %vm523_vm2, %v1898_v17 }
  0xf2   : > { %v658_v36 = vadd.f32 %v1621_v11, %v657_v34  ;;  %683 = vrot.lane.b32.xlu0 %v1989_v19, %s1895_s22  ;;  %v511_v46 = vadd.f32 %v1692_v45, %v1621_v11  ;;  %v502_v47 = vpop.f32.mrb[7].mxu0  ;;  %538 = vst.msk [vmem:[#allocation4 + $0x30] sm:$0xff] %vm523_vm2, %v1898_v17  ;;  %539 = vst.msk [vmem:[#allocation4 + $0x38] sm:$0xff] %vm523_vm2, %v1898_v17 }
  0xf3   : > { %v1997_v38 = vpack.c.bf16 %v666_v33, %v663_v25  ;;  %v503_v48 = vadd.f32 %v1621_v11, %v502_v47  ;;  %540 = vst.msk [vmem:[#allocation5] sm:$0xff] %vm436_vm0, %v1898_v17  ;;  %541 = vst.msk [vmem:[#allocation5 + $0x8] sm:$0xff] %vm436_vm0, %v1898_v17  ;;  %v2084_v25 = vld [vmem:[#allocation3 + $0x10] sm:$0xff]  ;;  %v2137_v47 = vld [vmem:[#allocation3 + $0x38] sm:$0xff] }
  0xf4   : > { %v1999_v41 = vpack.c.bf16 %v658_v36, %v655_v29  ;;  %v517_v49 = vpack.c.bf16 %v511_v46, %v508_v42  ;;  %542 = vst.msk [vmem:[#allocation5 + $0x10] sm:$0xff] %vm436_vm0, %v1898_v17  ;;  %543 = vst.msk [vmem:[#allocation5 + $0x18] sm:$0xff] %vm436_vm0, %v1898_v17 }
  0xf5   : > { %v516_v50 = vpack.c.bf16 %v503_v48, %v500_v44  ;;  %v674_v61 = vld [vmem:[#allocation2 + $0x8] sm:$0xff]  ;;  %544 = vst.msk [vmem:[#allocation5 + $0x20] sm:$0xff] %vm436_vm0, %v1898_v17  ;;  %545 = vst.msk [vmem:[#allocation5 + $0x28] sm:$0xff] %vm436_vm0, %v1898_v17 }
  0xf6   : > { %685 = vrot.lane.b32.xlu1 %v1999_v41, %s1895_s22  ;;  %522 = vst.msk [vmem:[#allocation2 + $0x18] sm:$0xff] %vm518_vm1, %v517_v49  ;;  %v673_v51 = vld [vmem:[#allocation2] sm:$0xff] }
  0xf7   : > { %521 = vst.msk [vmem:[#allocation2 + $0x10] sm:$0xff] %vm518_vm1, %v516_v50  ;;  %1711 = vmatprep.mubr.msk.bf16.mxu0 %vm518_vm1, %v673_v51 }
  0xf8   : > { %546 = vst.msk [vmem:[#allocation5 + $0x30] sm:$0xff] %vm436_vm0, %v1898_v17  ;;  %547 = vst.msk [vmem:[#allocation5 + $0x38] sm:$0xff] %vm436_vm0, %v1898_v17 }
  0xfa   : > { %687 = vrot.lane.b32.xlu1 %v1997_v38, %s1895_s22 }
  0xfd   : > { %v676_v62 = vld [vmem:[#allocation2 + $0x18] sm:$0xff] }
  0xfe   : > { %v675_v60 = vld [vmem:[#allocation2 + $0x10] sm:$0xff] }
 0x160   : > { %v682_v52 = vpop.permute.xlu0 %681 }
 0x161   : > { %v703_v53 = vsel %vm518_vm1, %v682_v52, 0  ;;  %1745 = vmatprep.subr.msk.bf16.mxu0 %vm518_vm1, %v682_v52 }
 0x162   : > { %1704 = vmatpush3.bf16.xpose.msra.mxu0 %v703_v53 }
 0x164   : > { %v684_v54 = vpop.permute.xlu0 %683 }
 0x165   : > { %1746 = vmatprep.subr.msk.bf16.mxu0 %vm518_vm1, %v684_v54  ;;  %v706_v55 = vsel %vm518_vm1, %v684_v54, 0 }
 0x168   : > { %v686_v56 = vpop.permute.xlu1 %685 }
 0x169   : > { %v709_v57 = vsel %vm518_vm1, %v686_v56, 0 }
 0x16a   : > { %1706 = vmatpush3.bf16.xpose.msra.mxu0 %v706_v55 }
 0x16b   : > { %1747 = vmatprep.subr.msk.bf16.mxu0 %vm518_vm1, %v686_v56 }
 0x16c   : > { %v688_v58 = vpop.permute.xlu1 %687 }
 0x16d   : > { %v712_v59 = vsel %vm518_vm1, %v688_v58, 0 }
 0x172   : > { %1708 = vmatpush3.bf16.xpose.msra.mxu0 %v709_v57 }
 0x173   : > { %1748 = vmatprep.subr.msk.bf16.mxu0 %vm518_vm1, %v688_v58 }
 0x17a   : > { %1710 = vmatpush3.bf16.xpose.msra.mxu0 %v712_v59 }
 0x181   : > { %1712 = vmatmul.mubr.msk.bf16.vlgmr.msra.gmra.mrb[8].mxu0 %vm518_vm1, %v674_v61 }
 0x182   : > { %1715 = vmatprep.mubr.msk.bf16.mxu0 %vm518_vm1, %v675_v60 }
 0x189   : > { %1716 = vmatmul.mubr.msk.bf16.gmra.mrb[12].mxu0 %vm518_vm1, %v676_v62 }
 0x254   : > { %v2029_v0 = vpop.f32.mrb[8].mxu0 }
 0x255   : > { %v2031_v1 = vpop.f32.mrb[9].mxu0  ;;  %v794_v6 = vsel %vm787_vm3, %v2029_v0, -inf }
 0x256   : > { %v2033_v2 = vpop.f32.mrb[10].mxu0  ;;  %v788_v3 = vsel %vm787_vm3, %v2031_v1, -inf }
 0x257   : > { %789 = vmax.xlane.f32.xlu0 %v788_v3  ;;  %v2037_v4 = vpop.f32.mrb[11].mxu0  ;;  %v797_v10 = vsel %vm787_vm3, %v2033_v2, -inf }
 0x258   : > { %v791_v5 = vsel %vm787_vm3, %v2037_v4, -inf }
 0x259   : > { %792 = vmax.xlane.f32.xlu1 %v791_v5 }
 0x25b   : > { %795 = vmax.xlane.f32.xlu0 %v794_v6 }
 0x25c   : > { %v2043_v7 = vpop.f32.mrb[12].mxu0 }
 0x25d   : > { %v2045_v8 = vpop.f32.mrb[13].mxu0  ;;  %v806_v13 = vsel %vm787_vm3, %v2043_v7, -inf }
 0x25e   : > { %v2047_v9 = vpop.f32.mrb[14].mxu0  ;;  %v800_v11 = vsel %vm787_vm3, %v2045_v8, -inf }
 0x25f   : > { %798 = vmax.xlane.f32.xlu0 %v797_v10  ;;  %801 = vmax.xlane.f32.xlu1 %v800_v11  ;;  %v2053_v12 = vpop.f32.mrb[15].mxu0  ;;  %v809_v15 = vsel %vm787_vm3, %v2047_v9, -inf }
 0x260   : > { %v803_v14 = vsel %vm787_vm3, %v2053_v12, -inf }
 0x263   : > { %807 = vmax.xlane.f32.xlu1 %v806_v13  ;;  %804 = vmax.xlane.f32.xlu0 %v803_v14 }
 0x267   : > { %810 = vmax.xlane.f32.xlu0 %v809_v15 }
 0x2e4   : > { %v790_v21 = vpop.xlane.xlu0 %789 }
 0x2e5   : > { %v2082_v23 = vmax.f32 %v2077_v18, %v790_v21 }
 0x2e6   : > { %v793_v24 = vpop.xlane.xlu1 %792 }
 0x2e7   : > { %v820_v26 = vsub.f32 %v2077_v18, %v2082_v23  ;;  %1130 = vst.msk [vmem:[#allocation3] sm:$0xff] %vm523_vm2, %v2082_v23  ;;  %v2091_v27 = vmax.f32 %v2079_v22, %v793_v24  ;;  %846 = vperm.xlu1 %1778, %v2082_v23  }
 0x2e8   : > { %v796_v28 = vpop.xlane.xlu0 %795 }
 0x2e9   : > { %v821_v29 = vsub.f32 %v2079_v22, %v2091_v27  ;;  %1131 = vst.msk [vmem:[#allocation3 + $0x8] sm:$0xff] %vm523_vm2, %v2091_v27  ;;  %v2099_v30 = vmax.f32 %v2084_v25, %v796_v28  ;;  %851 = vperm.xlu0 %1779, %v2091_v27  }
 0x2eb   : > { %v822_v33 = vsub.f32 %v2084_v25, %v2099_v30  ;;  %1132 = vst.msk [vmem:[#allocation3 + $0x10] sm:$0xff] %vm523_vm2, %v2099_v30  ;;  %856 = vperm.xlu1 %1778, %v2099_v30   ;;  %v830_v25 = vmul.f32 1.442695, %v821_v29 }
 0x2ec   : > { %v799_v34 = vpop.xlane.xlu0 %798  ;;  %v802_v35 = vpop.xlane.xlu1 %801 }
 0x2ed   : > { %v2112_v36 = vmax.f32 %v2102_v31, %v799_v34  ;;  %v2115_v37 = vmax.f32 %v2104_v32, %v802_v35  ;;  %1029 = vrot.lane.b32.xlu0 %v1999_v41, %s1899_s23 }
 0x2ef   : > { %v823_v42 = vsub.f32 %v2102_v31, %v2112_v36  ;;  %1133 = vst.msk [vmem:[#allocation3 + $0x18] sm:$0xff] %vm523_vm2, %v2112_v36  ;;  %v824_v43 = vsub.f32 %v2104_v32, %v2115_v37  ;;  %1134 = vst.msk [vmem:[#allocation3 + $0x20] sm:$0xff] %vm523_vm2, %v2115_v37  ;;  %861 = vperm.xlu1 %1778, %v2112_v36  }
 0x2f0   : > { %v808_v44 = vpop.xlane.xlu1 %807  ;;  %v805_v41 = vpop.xlane.xlu0 %804 }
 0x2f1   : > { %v2132_v45 = vmax.f32 %v2118_v39, %v808_v44  ;;  %v2135_v46 = vmax.f32 %v2120_v40, %v805_v41  ;;  %v834_v18 = vmul.f32 1.442695, %v823_v42  ;;  %v836_v31 = vmul.f32 1.442695, %v824_v43  ;;  %v909_v43 = vld [vmem:[#allocation4 + $0x8] sm:$0xff] }
 0x2f3   : > { %v826_v48 = vsub.f32 %v2118_v39, %v2132_v45  ;;  %1136 = vst.msk [vmem:[#allocation3 + $0x30] sm:$0xff] %vm523_vm2, %v2132_v45  ;;  %v825_v49 = vsub.f32 %v2120_v40, %v2135_v46  ;;  %1135 = vst.msk [vmem:[#allocation3 + $0x28] sm:$0xff] %vm523_vm2, %v2135_v46  ;;  %876 = vperm.xlu1 %1778, %v2132_v45  }
 0x2f4   : > { %v811_v50 = vpop.xlane.xlu0 %810 }
 0x2f5   : > { %v2149_v51 = vmax.f32 %v2137_v47, %v811_v50  ;;  %v838_v23 = vmul.f32 1.442695, %v825_v49  ;;  %v840_v22 = vmul.f32 1.442695, %v826_v48  ;;  %v910_v49 = vld [vmem:[#allocation4 + $0x10] sm:$0xff] }
 0x2f7   : > { %v827_v52 = vsub.f32 %v2137_v47, %v2149_v51  ;;  %1137 = vst.msk [vmem:[#allocation3 + $0x38] sm:$0xff] %vm523_vm2, %v2149_v51  ;;  %866 = vperm.xlu1 %1778, %v2115_v37   ;;  %v908_v37 = vld [vmem:[#allocation4] sm:$0xff] }
 0x2f9   : > { %v842_v30 = vmul.f32 1.442695, %v827_v52 }
 0x2fb   : > { %881 = vperm.xlu1 %1778, %v2149_v51  }
 0x2ff   : > { %871 = vperm.xlu1 %1778, %v2135_v46  }
 0x303   : > { %1025 = vrot.lane.b32.xlu1 %v1991_v20, %s1899_s23 }
 0x307   : > { %1027 = vrot.lane.b32.xlu1 %v1989_v19, %s1899_s23 }
 0x30b   : > { %1031 = vrot.lane.b32.xlu1 %v1997_v38, %s1899_s23 }
 0x366   : > { %v847_v53 = vpop.permute.xlu1 %846 }
 0x367   : > { %v884_v54 = vsub.f32 %v2031_v1, %v847_v53 }
 0x368   : > { %v852_v55 = vpop.permute.xlu0 %851 }
 0x369   : > { %v892_v56 = vmul.f32 1.442695, %v884_v54  ;;  %v885_v57 = vsub.f32 %v2037_v4, %v852_v55 }
 0x36a   : > { %v857_v58 = vpop.permute.xlu1 %856 }
 0x36b   : > { %1791 = vpow2.f32 %v892_v56  ;;  %v894_v59 = vmul.f32 1.442695, %v885_v57  ;;  %v886_v60 = vsub.f32 %v2029_v0, %v857_v58  ;;  %v828_v58 = vmul.f32 1.442695, %v820_v26 }
 0x36c   : > { %v1030_v53 = vpop.permute.xlu0 %1029 }
 0x36d   : > { %1793 = vpow2.f32 %v894_v59  ;;  %v896_v61 = vmul.f32 1.442695, %v886_v60 }
 0x36e   : > { %v862_v62 = vpop.permute.xlu1 %861 }
 0x36f   : > { %1795 = vpow2.f32 %v896_v61  ;;  %v887_v19 = vsub.f32 %v2033_v2, %v862_v62  ;;  %v832_v61 = vmul.f32 1.442695, %v822_v33 }
 0x371   : > { %v898_v20 = vmul.f32 1.442695, %v887_v19 }
 0x372   : > { %v877_v38 = vpop.permute.xlu1 %876 }
 0x373   : > { %1797 = vpow2.f32 %v898_v20  ;;  %v890_v1 = vsub.f32 %v2043_v7, %v877_v38  ;;  %v911_v20 = vld [vmem:[#allocation4 + $0x18] sm:$0xff] }
 0x375   : > { %v1792_v63 = vpop.eup %1791  ;;  %v904_v13 = vmul.f32 1.442695, %v890_v1 }
 0x376   : > { %v867_v3 = vpop.permute.xlu1 %866  ;;  %v924_v4 = vsel %vm787_vm3, %v1792_v63, 0.0 }
 0x377   : > { %v1794_v5 = vpop.eup %1793  ;;  %v888_v6 = vsub.f32 %v2045_v8, %v867_v3  ;;  %925 = vadd.xlane.f32.xlu0 %v924_v4 }
 0x378   : > { %v927_v0 = vsel %vm787_vm3, %v1794_v5, 0.0  ;;  %v1021_v10 = vpack.c.bf16 %v1794_v5, %v1792_v63  ;;  %v912_v5 = vld [vmem:[#allocation4 + $0x20] sm:$0xff] }
 0x379   : > { %v1796_v11 = vpop.eup %1795  ;;  %v900_v14 = vmul.f32 1.442695, %v888_v6  ;;  %928 = vadd.xlane.f32.xlu1 %v927_v0 }
 0x37a   : > { %v882_v2 = vpop.permute.xlu1 %881  ;;  %1727 = vmatprep.mubr.msk.bf16.mxu1 %vm787_vm3, %v1021_v10  ;;  %v930_v15 = vsel %vm787_vm3, %v1796_v11, 0.0 }
 0x37b   : > { %1799 = vpow2.f32 %v900_v14  ;;  %v891_v7 = vsub.f32 %v2047_v9, %v882_v2  ;;  %931 = vadd.xlane.f32.xlu0 %v930_v15 }
 0x37c   : > { %1801 = vpow2.f32 %v904_v13  ;;  %v914_v13 = vld [vmem:[#allocation4 + $0x30] sm:$0xff] }
 0x37d   : > { %v1798_v16 = vpop.eup %1797  ;;  %v906_v8 = vmul.f32 1.442695, %v891_v7 }
 0x37e   : > { %v1022_v17 = vpack.c.bf16 %v1798_v16, %v1796_v11  ;;  %v872_v21 = vpop.permute.xlu1 %871  ;;  %v933_v24 = vsel %vm787_vm3, %v1798_v16, 0.0  ;;  %v913_v16 = vld [vmem:[#allocation4 + $0x28] sm:$0xff] }
 0x37f   : > { %1803 = vpow2.f32 %v906_v8  ;;  %v889_v28 = vsub.f32 %v2053_v12, %v872_v21  ;;  %934 = vadd.xlane.f32.xlu0 %v933_v24 }
 0x381   : > { %v902_v34 = vmul.f32 1.442695, %v889_v28 }
 0x382   : > { %v1026_v35 = vpop.permute.xlu1 %1025 }
 0x383   : > { %1805 = vpow2.f32 %v902_v34  ;;  %1719 = vmatprep.subr.bf16.mxu1 %v1026_v35  ;;  %v915_v34 = vld [vmem:[#allocation4 + $0x38] sm:$0xff] }
 0x384   : > { %1720 = vmatpush3.bf16.msra.mxu1 %v1026_v35  ;;  %1807 = vpow2.f32 %v828_v58 }
 0x385   : > { %v1800_v44 = vpop.eup %1799  ;;  %1809 = vpow2.f32 %v832_v61 }
 0x386   : > { %v1028_v41 = vpop.permute.xlu1 %1027  ;;  %v936_v9 = vsel %vm787_vm3, %v1800_v44, 0.0  ;;  %v1802_v50 = vpop.eup %1801  ;;  %1811 = vpow2.f32 %v834_v18 }
 0x387   : > { %1721 = vmatprep.subr.bf16.mxu1 %v1028_v41  ;;  %937 = vadd.xlane.f32.xlu1 %v936_v9  ;;  %v942_v55 = vsel %vm787_vm3, %v1802_v50, 0.0  ;;  %1813 = vpow2.f32 %v838_v23 }
 0x388   : > { %1722 = vmatpush3.bf16.msra.mxu1 %v1028_v41  ;;  %1815 = vpow2.f32 %v830_v25  ;;  %v967_v25 = vld [vmem:[#allocation5 + $0x10] sm:$0xff] }
 0x389   : > { %v1804_v54 = vpop.eup %1803  ;;  %1723 = vmatprep.subr.bf16.mxu1 %v1030_v53  ;;  %1817 = vpow2.f32 %v842_v30  ;;  %v968_v30 = vld [vmem:[#allocation5 + $0x18] sm:$0xff] }
 0x38a   : > { %v1024_v12 = vpack.c.bf16 %v1804_v54, %v1802_v50  ;;  %v1032_v56 = vpop.permute.xlu1 %1031  ;;  %v945_v62 = vsel %vm787_vm3, %v1804_v54, 0.0  ;;  %1819 = vpow2.f32 %v836_v31 }
 0x38b   : > { %943 = vadd.xlane.f32.xlu1 %v942_v55  ;;  %1821 = vpow2.f32 %v840_v22  ;;  %v966_v22 = vld [vmem:[#allocation5 + $0x8] sm:$0xff] }
 0x38c   : > { %1724 = vmatpush3.bf16.msra.mxu1 %v1030_v53 }
 0x38d   : > { %v1806_v57 = vpop.eup %1805  ;;  %1725 = vmatprep.subr.bf16.mxu1 %v1032_v56 }
 0x38e   : > { %v939_v59 = vsel %vm787_vm3, %v1806_v57, 0.0  ;;  %v1023_v60 = vpack.c.bf16 %v1806_v57, %v1800_v44  ;;  %v1808_v26 = vpop.eup %1807 }
 0x38f   : > { %940 = vadd.xlane.f32.xlu0 %v939_v59  ;;  %v1810_v33 = vpop.eup %1809  ;;  %v916_v46 = vmul.f32 %v1808_v26, %v908_v37 }
 0x390   : > { %1726 = vmatpush3.bf16.msra.mxu1 %v1032_v56  ;;  %v1812_v27 = vpop.eup %1811  ;;  %v918_v52 = vmul.f32 %v1810_v33, %v910_v49 }
 0x391   : > { %v1814_v29 = vpop.eup %1813  ;;  %v919_v63 = vmul.f32 %v1812_v27, %v911_v20  ;;  %v970_v20 = vld [vmem:[#allocation5 + $0x28] sm:$0xff] }
 0x392   : > { %v1816_v36 = vpop.eup %1815  ;;  %v921_v24 = vmul.f32 %v1814_v29, %v913_v16 }
 0x393   : > { %946 = vadd.xlane.f32.xlu0 %v945_v62  ;;  %1728 = vmatmul.mubr.msk.bf16.vlgmr.msra.gmra.mrb[8].mxu1 %vm787_vm3, %v1022_v17  ;;  %v1818_v40 = vpop.eup %1817  ;;  %v917_v45 = vmul.f32 %v1816_v36, %v909_v43 }
 0x394   : > { %1731 = vmatprep.mubr.msk.bf16.mxu1 %vm787_vm3, %v1023_v60  ;;  %v1820_v42 = vpop.eup %1819  ;;  %v923_v9 = vmul.f32 %v1818_v40, %v915_v34 }
 0x395   : > { %v1822_v32 = vpop.eup %1821  ;;  %v920_v10 = vmul.f32 %v1820_v42, %v912_v5 }
 0x396   : > { %v922_v15 = vmul.f32 %v1822_v32, %v914_v13 }
 0x39b   : > { %1732 = vmatmul.mubr.msk.bf16.gmra.mrb[12].mxu1 %vm787_vm3, %v1024_v12 }
 0x39c   : > { %975 = vperm.xlu1 %1778, %v1808_v26   ;;  %v965_v26 = vld [vmem:[#allocation5] sm:$0xff] }
 0x3a0   : > { %985 = vperm.xlu1 %1778, %v1810_v33  }
 0x3a4   : > { %990 = vperm.xlu1 %1778, %v1812_v27  }
 0x3a8   : > { %1000 = vperm.xlu1 %1778, %v1814_v29  }
 0x3a9   : > { %980 = vperm.xlu0 %1779, %v1816_v36  }
 0x3ac   : > { %1010 = vperm.xlu1 %1778, %v1818_v40  }
 0x3ad   : > { %995 = vperm.xlu0 %1779, %v1820_v42  }
 0x3b1   : > { %1005 = vperm.xlu0 %1779, %v1822_v32  }
 0x404   : > { %v926_v47 = vpop.xlane.xlu0 %925 }
 0x405   : > { %v948_v39 = vadd.f32 %v926_v47, %v916_v46 }
 0x406   : > { %v929_v48 = vpop.xlane.xlu1 %928 }
 0x407   : > { %957 = vst.msk [vmem:[#allocation4] sm:$0xff] %vm523_vm2, %v948_v39  ;;  %v949_v51 = vadd.f32 %v929_v48, %v917_v45  ;;  %v971_v39 = vld [vmem:[#allocation5 + $0x30] sm:$0xff] }
 0x408   : > { %v932_v19 = vpop.xlane.xlu0 %931 }
 0x409   : > { %958 = vst.msk [vmem:[#allocation4 + $0x8] sm:$0xff] %vm523_vm2, %v949_v51  ;;  %v950_v38 = vadd.f32 %v932_v19, %v918_v52  ;;  %v969_v51 = vld [vmem:[#allocation5 + $0x20] sm:$0xff]  ;;  %v972_v52 = vld [vmem:[#allocation5 + $0x38] sm:$0xff] }
 0x40b   : > { %959 = vst.msk [vmem:[#allocation4 + $0x10] sm:$0xff] %vm523_vm2, %v950_v38 }
 0x40c   : > { %v935_v1 = vpop.xlane.xlu0 %934 }
 0x40d   : > { %v951_v3 = vadd.f32 %v935_v1, %v919_v63 }
 0x40e   : > { %v1149_v4 = vld [vmem:[#allocation4] sm:$0xff] }
 0x40f   : > { %960 = vst.msk [vmem:[#allocation4 + $0x18] sm:$0xff] %vm523_vm2, %v951_v3  ;;  %1823 = vrcp.f32 %v1149_v4 }
 0x410   : > { %v1150_v6 = vld [vmem:[#allocation4 + $0x8] sm:$0xff] }
 0x411   : > { %1825 = vrcp.f32 %v1150_v6 }
 0x412   : > { %v1151_v0 = vld [vmem:[#allocation4 + $0x10] sm:$0xff] }
 0x413   : > { %1827 = vrcp.f32 %v1151_v0 }
 0x414   : > { %v938_v11 = vpop.xlane.xlu1 %937 }
 0x415   : > { %v952_v14 = vadd.f32 %v938_v11, %v920_v10 }
 0x416   : > { %v1152_v2 = vld [vmem:[#allocation4 + $0x18] sm:$0xff] }
 0x417   : > { %961 = vst.msk [vmem:[#allocation4 + $0x20] sm:$0xff] %vm523_vm2, %v952_v14  ;;  %1829 = vrcp.f32 %v1152_v2 }
 0x418   : > { %v944_v7 = vpop.xlane.xlu1 %943 }
 0x419   : > { %v1824_v8 = vpop.eup %1823  ;;  %v954_v17 = vadd.f32 %v944_v7, %v922_v15 }
 0x41a   : > { %1167 = vperm.xlu0 %1779, %v1824_v8  }
 0x41b   : > { %v1826_v21 = vpop.eup %1825  ;;  %963 = vst.msk [vmem:[#allocation4 + $0x30] sm:$0xff] %vm523_vm2, %v954_v17 }
 0x41c   : > { %1172 = vperm.xlu1 %1778, %v1826_v21   ;;  %v941_v28 = vpop.xlane.xlu0 %940  ;;  %v976_v61 = vpop.permute.xlu1 %975 }
 0x41d   : > { %v1828_v35 = vpop.eup %1827  ;;  %v953_v44 = vadd.f32 %v941_v28, %v921_v24  ;;  %v1013_v27 = vmul.f32 %v976_v61, %v965_v26 }
 0x41e   : > { %1177 = vperm.xlu0 %1779, %v1828_v35   ;;  %v1153_v41 = vld [vmem:[#allocation4 + $0x20] sm:$0xff] }
 0x41f   : > { %962 = vst.msk [vmem:[#allocation4 + $0x28] sm:$0xff] %vm523_vm2, %v953_v44  ;;  %1831 = vrcp.f32 %v1153_v41 }
 0x420   : > { %v947_v50 = vpop.xlane.xlu0 %946  ;;  %v986_v62 = vpop.permute.xlu1 %985 }
 0x421   : > { %v1830_v53 = vpop.eup %1829  ;;  %v955_v54 = vadd.f32 %v947_v50, %v923_v9  ;;  %v1015_v33 = vmul.f32 %v986_v62, %v967_v25 }
 0x422   : > { %1182 = vperm.xlu1 %1778, %v1830_v53   ;;  %v1155_v55 = vld [vmem:[#allocation4 + $0x30] sm:$0xff] }
 0x423   : > { %964 = vst.msk [vmem:[#allocation4 + $0x38] sm:$0xff] %vm523_vm2, %v955_v54  ;;  %1833 = vrcp.f32 %v1155_v55 }
 0x424   : > { %v991_v23 = vpop.permute.xlu1 %990 }
 0x425   : > { %v1016_v40 = vmul.f32 %v991_v23, %v968_v30 }
 0x426   : > { %v1154_v12 = vld [vmem:[#allocation4 + $0x28] sm:$0xff] }
 0x427   : > { %1835 = vrcp.f32 %v1154_v12 }
 0x428   : > { %v981_v18 = vpop.permute.xlu0 %980  ;;  %v1001_v29 = vpop.permute.xlu1 %1000 }
 0x429   : > { %v1832_v56 = vpop.eup %1831  ;;  %v1014_v37 = vmul.f32 %v981_v18, %v966_v22  ;;  %v1018_v6 = vmul.f32 %v1001_v29, %v970_v20 }
 0x42a   : > { %1187 = vperm.xlu0 %1779, %v1832_v56   ;;  %v1156_v57 = vld [vmem:[#allocation4 + $0x38] sm:$0xff] }
 0x42b   : > { %1837 = vrcp.f32 %v1156_v57 }
 0x42c   : > { %v996_v31 = vpop.permute.xlu0 %995  ;;  %v1011_v19 = vpop.permute.xlu1 %1010 }
 0x42d   : > { %v1834_v58 = vpop.eup %1833  ;;  %v1017_v63 = vmul.f32 %v996_v31, %v969_v51  ;;  %v1020_v3 = vmul.f32 %v1011_v19, %v972_v52 }
 0x42e   : > { %1197 = vperm.xlu0 %1779, %v1834_v58  }
 0x430   : > { %v1006_v45 = vpop.permute.xlu0 %1005 }
 0x431   : > { %v1836_v59 = vpop.eup %1835  ;;  %v1019_v38 = vmul.f32 %v1006_v45, %v971_v39 }
 0x432   : > { %1192 = vperm.xlu1 %1778, %v1836_v59  }
 0x435   : > { %v1838_v60 = vpop.eup %1837 }
 0x436   : > { %1202 = vperm.xlu1 %1778, %v1838_v60  }
 0x466   : > { %v1729_v36 = vpop.f32.mrb[8].mxu1 }
 0x467   : > { %v1116_v42 = vadd.f32 %v1729_v36, %v1015_v33  ;;  %v1083_v32 = vpop.f32.mrb[9].mxu1 }
 0x468   : > { %v1114_v43 = vadd.f32 %v1083_v32, %v1013_v27  ;;  %v1730_v46 = vpop.f32.mrb[10].mxu1 }
 0x469   : > { %1124 = vst.msk [vmem:[#allocation5 + $0x10] sm:$0xff] %vm436_vm0, %v1116_v42  ;;  %v1117_v47 = vadd.f32 %v1730_v46, %v1016_v40  ;;  %v1086_v49 = vpop.f32.mrb[11].mxu1 }
 0x46a   : > { %1122 = vst.msk [vmem:[#allocation5] sm:$0xff] %vm436_vm0, %v1114_v43  ;;  %v1115_v48 = vadd.f32 %v1086_v49, %v1014_v37 }
 0x46b   : > { %1125 = vst.msk [vmem:[#allocation5 + $0x18] sm:$0xff] %vm436_vm0, %v1117_v47 }
 0x46c   : > { %1123 = vst.msk [vmem:[#allocation5 + $0x8] sm:$0xff] %vm436_vm0, %v1115_v48 }
 0x46e   : > { %v1733_v1 = vpop.f32.mrb[12].mxu1 }
 0x46f   : > { %v1120_v4 = vadd.f32 %v1733_v1, %v1019_v38  ;;  %v1099_v5 = vpop.f32.mrb[13].mxu1 }
 0x470   : > { %v1118_v0 = vadd.f32 %v1099_v5, %v1017_v63  ;;  %v1734_v10 = vpop.f32.mrb[14].mxu1  ;;  %v1143_v24 = vld [vmem:[#allocation5 + $0x10] sm:$0xff] }
 0x471   : > { %1128 = vst.msk [vmem:[#allocation5 + $0x30] sm:$0xff] %vm436_vm0, %v1120_v4  ;;  %v1121_v11 = vadd.f32 %v1734_v10, %v1020_v3  ;;  %v1102_v13 = vpop.f32.mrb[15].mxu1  ;;  %v1141_v2 = vld [vmem:[#allocation5] sm:$0xff] }
 0x472   : > { %1126 = vst.msk [vmem:[#allocation5 + $0x20] sm:$0xff] %vm436_vm0, %v1118_v0  ;;  %v1119_v14 = vadd.f32 %v1102_v13, %v1018_v6  ;;  %v1144_v41 = vld [vmem:[#allocation5 + $0x18] sm:$0xff] }
 0x473   : > { %1129 = vst.msk [vmem:[#allocation5 + $0x38] sm:$0xff] %vm436_vm0, %v1121_v11  ;;  %v1142_v8 = vld [vmem:[#allocation5 + $0x8] sm:$0xff] }
 0x474   : > { %1127 = vst.msk [vmem:[#allocation5 + $0x28] sm:$0xff] %vm436_vm0, %v1119_v14 }
 0x478   : > { %v1147_v57 = vld [vmem:[#allocation5 + $0x30] sm:$0xff] }
 0x479   : > { %v1145_v54 = vld [vmem:[#allocation5 + $0x20] sm:$0xff] }
 0x47a   : > { %v1148_v25 = vld [vmem:[#allocation5 + $0x38] sm:$0xff] }
 0x47b   : > { %v1146_v61 = vld [vmem:[#allocation5 + $0x28] sm:$0xff] }
 0x499   : > { %v1168_v15 = vpop.permute.xlu0 %1167 }
 0x49a   : > { %v1205_v7 = vmul.f32 %v1168_v15, %v1141_v2 }
 0x49b   : > { %v1173_v16 = vpop.permute.xlu1 %1172 }
 0x49c   : > { %v1206_v17 = vmul.f32 %v1173_v16, %v1142_v8  ;;  %v1213_v21 = vsel %vm436_vm0, %v1205_v7, 0.0 }
 0x49d   : > { %1214 = vadd.xlane.f32.xlu0 %v1213_v21  ;;  %v1178_v28 = vpop.permute.xlu0 %1177 }
 0x49e   : > { %v1207_v34 = vmul.f32 %v1178_v28, %v1143_v24  ;;  %v1216_v35 = vsel %vm436_vm0, %v1206_v17, 0.0  ;;  %v1790_v28 = vld [vmem:[%s2330_s6] sm:$0xff]  }
 0x49f   : > { %1217 = vadd.xlane.f32.xlu1 %v1216_v35  ;;  %1735 = vmatprep.subr.bf16.mxu1 %v1790_v28 }
 0x4a0   : > { %v1219_v44 = vsel %vm436_vm0, %v1207_v34, 0.0  ;;  %1736 = vmatpush3.bf16.msra.mxu1 %v1790_v28 }
 0x4a1   : > { %v1183_v9 = vpop.permute.xlu1 %1182  ;;  %1220 = vadd.xlane.f32.xlu0 %v1219_v44 }
 0x4a2   : > { %v1208_v50 = vmul.f32 %v1183_v9, %v1144_v41 }
 0x4a4   : > { %v1222_v53 = vsel %vm436_vm0, %v1208_v50, 0.0 }
 0x4a5   : > { %1223 = vadd.xlane.f32.xlu0 %v1222_v53 }
 0x4a9   : > { %v1188_v55 = vpop.permute.xlu0 %1187 }
 0x4aa   : > { %v1209_v12 = vmul.f32 %v1188_v55, %v1145_v54 }
 0x4ac   : > { %v1225_v56 = vsel %vm436_vm0, %v1209_v12, 0.0 }
 0x4ad   : > { %1226 = vadd.xlane.f32.xlu1 %v1225_v56  ;;  %v1198_v58 = vpop.permute.xlu0 %1197 }
 0x4ae   : > { %v1211_v59 = vmul.f32 %v1198_v58, %v1147_v57 }
 0x4b0   : > { %v1231_v60 = vsel %vm436_vm0, %v1211_v59, 0.0 }
 0x4b1   : > { %v1193_v62 = vpop.permute.xlu1 %1192  ;;  %1232 = vadd.xlane.f32.xlu1 %v1231_v60 }
 0x4b2   : > { %v1210_v18 = vmul.f32 %v1193_v62, %v1146_v61 }
 0x4b4   : > { %v1228_v23 = vsel %vm436_vm0, %v1210_v18, 0.0 }
 0x4b5   : > { %v1203_v26 = vpop.permute.xlu1 %1202  ;;  %1229 = vadd.xlane.f32.xlu0 %v1228_v23 }
 0x4b6   : > { %v1212_v30 = vmul.f32 %v1203_v26, %v1148_v25 }
 0x4b8   : > { %v1234_v31 = vsel %vm436_vm0, %v1212_v30, 0.0 }
 0x4b9   : > { %1235 = vadd.xlane.f32.xlu0 %v1234_v31 }
 0x52a   : > { %v1215_v33 = vpop.xlane.xlu0 %1214 }
 0x52b   : > { %v1238_v22 = vmul.f32 0.0625, %v1215_v33 }
 0x52c   : > { %v1218_v27 = vpop.xlane.xlu1 %1217 }
 0x52d   : > { %v2229_v29 = vsub.f32 %v1205_v7, %v1238_v22  ;;  %v1239_v36 = vmul.f32 0.0625, %v1218_v27 }
 0x52e   : > { %v1221_v40 = vpop.xlane.xlu0 %1220 }
 0x52f   : > { %v2231_v42 = vsub.f32 %v1206_v17, %v1239_v36  ;;  %v1240_v32 = vmul.f32 0.0625, %v1221_v40  ;;  %v1254_v37 = vmul.f32 %v2229_v29, %v2229_v29 }
 0x531   : > { %v2235_v43 = vsub.f32 %v1207_v34, %v1240_v32  ;;  %v1262_v46 = vsel %vm436_vm0, %v1254_v37, 0.0  ;;  %v1255_v47 = vmul.f32 %v2231_v42, %v2231_v42 }
 0x532   : > { %1263 = vadd.xlane.f32.xlu1 %v1262_v46  ;;  %v1224_v49 = vpop.xlane.xlu0 %1223 }
 0x533   : > { %v1241_v39 = vmul.f32 0.0625, %v1224_v49  ;;  %v1265_v45 = vsel %vm436_vm0, %v1255_v47, 0.0  ;;  %v1256_v48 = vmul.f32 %v2235_v43, %v2235_v43 }
 0x534   : > { %1266 = vadd.xlane.f32.xlu0 %v1265_v45 }
 0x535   : > { %v2243_v51 = vsub.f32 %v1208_v50, %v1241_v39  ;;  %v1268_v52 = vsel %vm436_vm0, %v1256_v48, 0.0 }
 0x536   : > { %1269 = vadd.xlane.f32.xlu1 %v1268_v52 }
 0x537   : > { %v1257_v19 = vmul.f32 %v2243_v51, %v2243_v51 }
 0x539   : > { %v1271_v20 = vsel %vm436_vm0, %v1257_v19, 0.0 }
 0x53a   : > { %v1227_v38 = vpop.xlane.xlu1 %1226  ;;  %1272 = vadd.xlane.f32.xlu0 %v1271_v20 }
 0x53b   : > { %v1242_v63 = vmul.f32 0.0625, %v1227_v38 }
 0x53d   : > { %v2249_v1 = vsub.f32 %v1209_v12, %v1242_v63 }
 0x53e   : > { %v1233_v3 = vpop.xlane.xlu1 %1232 }
 0x53f   : > { %v1244_v4 = vmul.f32 0.0625, %v1233_v3  ;;  %v1258_v5 = vmul.f32 %v2249_v1, %v2249_v1 }
 0x541   : > { %v2253_v6 = vsub.f32 %v1211_v59, %v1244_v4  ;;  %v1274_v0 = vsel %vm436_vm0, %v1258_v5, 0.0  ;;  %v1639_v59 = vld [vmem:[%s2328_s4] ss:$0 sm:$0xff] }
 0x542   : > { %1275 = vadd.xlane.f32.xlu1 %v1274_v0  ;;  %v1230_v10 = vpop.xlane.xlu0 %1229 }
 0x543   : > { %v1243_v11 = vmul.f32 0.0625, %v1230_v10  ;;  %v1260_v13 = vmul.f32 %v2253_v6, %v2253_v6 }
 0x545   : > { %v2258_v14 = vsub.f32 %v1210_v18, %v1243_v11  ;;  %v1280_v2 = vsel %vm436_vm0, %v1260_v13, 0.0 }
 0x546   : > { %1281 = vadd.xlane.f32.xlu1 %v1280_v2  ;;  %v1236_v15 = vpop.xlane.xlu0 %1235 }
 0x547   : > { %v1245_v7 = vmul.f32 0.0625, %v1236_v15  ;;  %v1259_v16 = vmul.f32 %v2258_v14, %v2258_v14 }
 0x549   : > { %v2263_v8 = vsub.f32 %v1212_v30, %v1245_v7  ;;  %v1277_v17 = vsel %vm436_vm0, %v1259_v16, 0.0  ;;  %v1640_v30 = vld [vmem:[%s2329_s5] ss:$0 sm:$0xff] }
 0x54a   : > { %1278 = vadd.xlane.f32.xlu0 %v1277_v17 }
 0x54b   : > { %v1261_v21 = vmul.f32 %v2263_v8, %v2263_v8 }
 0x54d   : > { %v1283_v24 = vsel %vm436_vm0, %v1261_v21, 0.0 }
 0x54e   : > { %1284 = vadd.xlane.f32.xlu0 %v1283_v24 }
 0x5bf   : > { %v1264_v34 = vpop.xlane.xlu1 %1263 }
 0x5c0   : > { %v1286_v35 = vmul.f32 0.0625, %v1264_v34 }
 0x5c1   : > { %v1267_v44 = vpop.xlane.xlu0 %1266 }
 0x5c2   : > { %v1294_v41 = vadd.f32 1e-06, %v1286_v35  ;;  %v1287_v9 = vmul.f32 0.0625, %v1267_v44 }
 0x5c3   : > { %v1270_v50 = vpop.xlane.xlu1 %1269 }
 0x5c4   : > { %1839 = vrsqrt.f32 %v1294_v41  ;;  %v1295_v53 = vadd.f32 1e-06, %v1287_v9  ;;  %v1288_v54 = vmul.f32 0.0625, %v1270_v50 }
 0x5c6   : > { %1841 = vrsqrt.f32 %v1295_v53  ;;  %v1296_v55 = vadd.f32 1e-06, %v1288_v54 }
 0x5c7   : > { %v1273_v12 = vpop.xlane.xlu0 %1272 }
 0x5c8   : > { %1843 = vrsqrt.f32 %v1296_v55  ;;  %v1289_v56 = vmul.f32 0.0625, %v1273_v12 }
 0x5ca   : > { %v1297_v57 = vadd.f32 1e-06, %v1289_v56 }
 0x5cc   : > { %1845 = vrsqrt.f32 %v1297_v57 }
 0x5ce   : > { %v1840_v58 = vpop.eup %1839 }
 0x5cf   : > { %v1310_v60 = vmul.f32 %v1840_v58, %v2229_v29  ;;  %v1276_v61 = vpop.xlane.xlu1 %1275 }
 0x5d0   : > { %v1842_v62 = vpop.eup %1841  ;;  %v1290_v18 = vmul.f32 0.0625, %v1276_v61 }
 0x5d1   : > { %v1311_v23 = vmul.f32 %v1842_v62, %v2231_v42  ;;  %v1325_v25 = vmul.f32 %v1639_v59, %v1310_v60 }
 0x5d2   : > { %v1844_v26 = vpop.eup %1843  ;;  %v1298_v31 = vadd.f32 1e-06, %v1290_v18 }
 0x5d3   : > { %v1312_v33 = vmul.f32 %v1844_v26, %v2235_v43  ;;  %v1282_v22 = vpop.xlane.xlu1 %1281  ;;  %v1326_v27 = vmul.f32 %v1639_v59, %v1311_v23  ;;  %v1340_v40 = vadd.f32 %v1640_v30, %v1325_v25 }
 0x5d4   : > { %v1292_v36 = vmul.f32 0.0625, %v1282_v22  ;;  %1847 = vrsqrt.f32 %v1298_v31 }
 0x5d5   : > { %v1341_v32 = vadd.f32 %v1640_v30, %v1326_v27  ;;  %v1327_v46 = vmul.f32 %v1639_v59, %v1312_v33 }
 0x5d6   : > { %v1846_v29 = vpop.eup %1845  ;;  %v1300_v37 = vadd.f32 1e-06, %v1292_v36 }
 0x5d7   : > { %v1313_v42 = vmul.f32 %v1846_v29, %v2243_v51  ;;  %v1279_v47 = vpop.xlane.xlu0 %1278  ;;  %v1348_v49 = vpack.c.bf16 %v1341_v32, %v1340_v40  ;;  %v1342_v43 = vadd.f32 %v1640_v30, %v1327_v46 }
 0x5d8   : > { %v1291_v39 = vmul.f32 0.0625, %v1279_v47  ;;  %1849 = vrsqrt.f32 %v1300_v37 }
 0x5d9   : > { %v1328_v45 = vmul.f32 %v1639_v59, %v1313_v42  ;;  %1737 = vmatprep.mubr.msk.bf16.mxu1 %vm436_vm0, %v1348_v49 }
 0x5da   : > { %v1299_v48 = vadd.f32 1e-06, %v1291_v39 }
 0x5db   : > { %v1343_v52 = vadd.f32 %v1640_v30, %v1328_v45  ;;  %v1285_v19 = vpop.xlane.xlu0 %1284 }
 0x5dc   : > { %1851 = vrsqrt.f32 %v1299_v48  ;;  %v1293_v20 = vmul.f32 0.0625, %v1285_v19 }
 0x5dd   : > { %v1349_v38 = vpack.c.bf16 %v1343_v52, %v1342_v43 }
 0x5de   : > { %v1301_v63 = vadd.f32 1e-06, %v1293_v20  ;;  %v1848_v3 = vpop.eup %1847 }
 0x5df   : > { %1738 = vmatmul.mubr.msk.bf16.vlgmr.msra.gmra.mrb[16].mxu1 %vm436_vm0, %v1349_v38  ;;  %v1314_v51 = vmul.f32 %v1848_v3, %v2249_v1 }
 0x5e0   : > { %1853 = vrsqrt.f32 %v1301_v63 }
 0x5e1   : > { %v1329_v11 = vmul.f32 %v1639_v59, %v1314_v51 }
 0x5e2   : > { %v1850_v4 = vpop.eup %1849 }
 0x5e3   : > { %v1316_v0 = vmul.f32 %v1850_v4, %v2253_v6  ;;  %v1344_v7 = vadd.f32 %v1640_v30, %v1329_v11  ;;  %v1641_v6 = vld [vmem:[%s2331_s7] ss:$0 sm:$0xff] }
 0x5e5   : > { %v1331_v17 = vmul.f32 %v1639_v59, %v1316_v0 }
 0x5e6   : > { %v1852_v5 = vpop.eup %1851 }
 0x5e7   : > { %v1315_v10 = vmul.f32 %v1852_v5, %v2258_v14  ;;  %v1346_v28 = vadd.f32 %v1640_v30, %v1331_v17 }
 0x5e9   : > { %v1330_v13 = vmul.f32 %v1639_v59, %v1315_v10 }
 0x5ea   : > { %v1854_v2 = vpop.eup %1853 }
 0x5eb   : > { %v1317_v15 = vmul.f32 %v1854_v2, %v2263_v8  ;;  %v1345_v16 = vadd.f32 %v1640_v30, %v1330_v13 }
 0x5ed   : > { %v1350_v21 = vpack.c.bf16 %v1345_v16, %v1344_v7  ;;  %v1332_v24 = vmul.f32 %v1639_v59, %v1317_v15 }
 0x5ef   : > { %1741 = vmatprep.mubr.msk.bf16.mxu1 %vm436_vm0, %v1350_v21  ;;  %v1347_v1 = vadd.f32 %v1640_v30, %v1332_v24 }
 0x5f1   : > { %v1351_v34 = vpack.c.bf16 %v1347_v1, %v1346_v28 }
 0x5f3   : > { %1742 = vmatmul.mubr.msk.bf16.gmra.mrb[20].mxu1 %vm436_vm0, %v1351_v34 }
 0x6b2   : > { %v1739_v14 = vpop.f32.mrb[16].mxu1 }
 0x6b3   : > { %v1422_v35 = vadd.f32 %v1739_v14, %v1641_v6  ;;  %v1413_v8 = vpop.f32.mrb[17].mxu1 }
 0x6b4   : > { %v1414_v44 = vadd.f32 %v1641_v6, %v1413_v8  ;;  %v1740_v41 = vpop.f32.mrb[18].mxu1 }
 0x6b5   : > { %v1454_v9 = vmul.f32 0.70710677, %v1422_v35  ;;  %v1425_v50 = vadd.f32 %v1740_v41, %v1641_v6  ;;  %v1416_v53 = vpop.f32.mrb[19].mxu1  ;;  %v1446_v59 = vmul.f32 0.5, %v1422_v35 }
 0x6b6   : > { %v1452_v54 = vmul.f32 0.70710677, %v1414_v44  ;;  %v1417_v55 = vadd.f32 %v1641_v6, %v1416_v53  ;;  %v1444_v62 = vmul.f32 0.5, %v1414_v44 }
 0x6b7   : > { %1855 = verf.f32 %v1454_v9  ;;  %v1455_v12 = vmul.f32 0.70710677, %v1425_v50  ;;  %v1447_v26 = vmul.f32 0.5, %v1425_v50 }
 0x6b8   : > { %1857 = verf.f32 %v1452_v54  ;;  %v1453_v56 = vmul.f32 0.70710677, %v1417_v55  ;;  %v1445_v33 = vmul.f32 0.5, %v1417_v55 }
 0x6b9   : > { %1859 = verf.f32 %v1455_v12 }
 0x6ba   : > { %1861 = verf.f32 %v1453_v56 }
 0x6c1   : > { %v1856_v57 = vpop.eup %1855 }
 0x6c2   : > { %v1858_v58 = vpop.eup %1857  ;;  %v1470_v60 = vadd.f32 1.0, %v1856_v57 }
 0x6c3   : > { %v1860_v61 = vpop.eup %1859  ;;  %v1468_v18 = vadd.f32 1.0, %v1858_v58 }
 0x6c4   : > { %v1862_v23 = vpop.eup %1861  ;;  %v1478_v25 = vmul.f32 %v1470_v60, %v1446_v59  ;;  %v1471_v30 = vadd.f32 1.0, %v1860_v61 }
 0x6c5   : > { %v1476_v31 = vmul.f32 %v1468_v18, %v1444_v62  ;;  %v1469_v22 = vadd.f32 1.0, %v1862_v23 }
 0x6c6   : > { %1486 = vst.msk [vmem:[%s2297_s17 + $0x10] sm:$0xff] %vm436_vm0, %v1478_v25  ;;  %v1479_v27 = vmul.f32 %v1471_v30, %v1447_v26  ;;  %v1743_v36 = vpop.f32.mrb[20].mxu1 }
 0x6c7   : > { %1484 = vst.msk [vmem:[%s2297_s17] sm:$0xff] %vm436_vm0, %v1476_v31  ;;  %v1477_v40 = vmul.f32 %v1469_v22, %v1445_v33  ;;  %v1438_v32 = vadd.f32 %v1743_v36, %v1641_v6  ;;  %v1429_v29 = vpop.f32.mrb[21].mxu1 }
 0x6c8   : > { %1487 = vst.msk [vmem:[%s2297_s17 + $0x18] sm:$0xff] %vm436_vm0, %v1479_v27  ;;  %v1430_v37 = vadd.f32 %v1641_v6, %v1429_v29  ;;  %v1744_v46 = vpop.f32.mrb[22].mxu1 }
 0x6c9   : > { %1485 = vst.msk [vmem:[%s2297_s17 + $0x8] sm:$0xff] %vm436_vm0, %v1477_v40  ;;  %v1458_v42 = vmul.f32 0.70710677, %v1438_v32  ;;  %v1441_v47 = vadd.f32 %v1744_v46, %v1641_v6  ;;  %v1432_v49 = vpop.f32.mrb[23].mxu1  ;;  %v1450_v20 = vmul.f32 0.5, %v1438_v32 }
 0x6ca   : > { %v1456_v39 = vmul.f32 0.70710677, %v1430_v37  ;;  %v1433_v45 = vadd.f32 %v1641_v6, %v1432_v49  ;;  %v1448_v3 = vmul.f32 0.5, %v1430_v37 }
 0x6cb   : > { %1863 = verf.f32 %v1458_v42  ;;  %v1459_v48 = vmul.f32 0.70710677, %v1441_v47  ;;  %v1451_v0 = vmul.f32 0.5, %v1441_v47 }
 0x6cc   : > { %1865 = verf.f32 %v1456_v39  ;;  %v1457_v43 = vmul.f32 0.70710677, %v1433_v45  ;;  %v1449_v13 = vmul.f32 0.5, %v1433_v45 }
 0x6cd   : > { %1867 = verf.f32 %v1459_v48 }
 0x6ce   : > { %1869 = verf.f32 %v1457_v43 }
 0x6d5   : > { %v1864_v52 = vpop.eup %1863 }
 0x6d6   : > { %v1866_v19 = vpop.eup %1865  ;;  %v1474_v38 = vadd.f32 1.0, %v1864_v52 }
 0x6d7   : > { %v1868_v63 = vpop.eup %1867  ;;  %v1472_v51 = vadd.f32 1.0, %v1866_v19 }
 0x6d8   : > { %v1870_v4 = vpop.eup %1869  ;;  %v1482_v5 = vmul.f32 %v1474_v38, %v1450_v20  ;;  %v1475_v10 = vadd.f32 1.0, %v1868_v63 }
 0x6d9   : > { %v1480_v11 = vmul.f32 %v1472_v51, %v1448_v3  ;;  %v1473_v2 = vadd.f32 1.0, %v1870_v4 }
 0x6da   : > { %1490 = vst.msk [vmem:[%s2297_s17 + $0x30] sm:$0xff] %vm436_vm0, %v1482_v5  ;;  %v1483_v15 = vmul.f32 %v1475_v10, %v1451_v0 }
 0x6db   : > { %1488 = vst.msk [vmem:[%s2297_s17 + $0x20] sm:$0xff] %vm436_vm0, %v1480_v11  ;;  %v1481_v7 = vmul.f32 %v1473_v2, %v1449_v13 }
 0x6dc   : > { %1491 = vst.msk [vmem:[%s2297_s17 + $0x38] sm:$0xff] %vm436_vm0, %v1483_v15 }
 0x6dd   : > { %1489 = vst.msk [vmem:[%s2297_s17 + $0x28] sm:$0xff] %vm436_vm0, %v1481_v7 }
 0x6de PF: > { %s18_s29 = sadd.s32 1, %s1893_s29   ;;  %s2333_s27 = smov %s1889_s28 }
 0x6df   : > { %p15_p5 = scmp.ge.s32.totalorder %s18_s29, 4   ;;  %s2334_s28 = smov %s2336_s30 }
 0x6e1   :  { %17 = sbr.rel (!%p15_p5) target bundleno = 2 (0x2), region = 93 }

</bundles_post_ra>
